<compile_context>
chip_gen: v6e
topology: v6e:2x2x1
jax: 0.10.0
libtpu: 0.0.40
codegen_flags: <defaults>
</compile_context>

<pallas_src>
import jax
import jax.numpy as jnp
from jax import lax
from jax.experimental import pallas as pl
from jax.experimental.pallas import tpu as pltpu

_PACK = 128  # input rows folded into one lane-dense row (vreg lane width)


def _dense_linear_kernel(x_ref, w_ref, b_ref, o_ref):
    """Lane-dense tile: (TB, 128*IN) @ (128*IN, 128*OUT) + (1, 128*OUT).

    W_exp[3*b + i, 2*b + o] = W[o, i]  (block-diagonal, zeros are exact f32),
    so one MXU matmul computes 128 independent 3->2 linears per reshaped row.
    HIGHEST precision keeps the f32 semantics of nn.Linear (default MXU
    precision would round x to bf16).
    """
    o_ref[...] = (
        jnp.dot(
            x_ref[...],
            w_ref[...],
            preferred_element_type=jnp.float32,
            precision=lax.Precision.HIGHEST,
        )
        + b_ref[...]
    ).astype(o_ref.dtype)


def _tail_linear_kernel(x_ref, w_ref, b_ref, o_ref):
    """VPU fallback for a <128-row tail.

    x_ref: (T, IN) f32 VMEM, w_ref: (OUT, IN) f32 SMEM, b_ref: (OUT,) f32 SMEM,
    o_ref: (T, OUT) f32 VMEM.  Statically unrolled MACs with SMEM scalars; the
    tail is at most 127 rows so its cost is negligible.
    """
    x = x_ref[...]
    out_f, in_f = w_ref.shape
    cols = []
    for o in range(out_f):
        acc = x[:, 0:1] * w_ref[o, 0]
        for i in range(1, in_f):
            acc = acc + x[:, i:i + 1] * w_ref[o, i]
        cols.append(acc + b_ref[o])
    o_ref[...] = jnp.concatenate(cols, axis=-1).astype(o_ref.dtype)


def _expand_params(weight, bias):
    """Block-expand (OUT, IN) weight / (OUT,) bias for the lane-dense matmul."""
    out_f, _ = weight.shape
    # kron(I_128, W.T)[3*b + i, 2*b + o] == W[o, i]; all other entries are 0.
    w_exp = jnp.kron(jnp.eye(_PACK, dtype=weight.dtype), weight.T)
    b_exp = jnp.tile(bias, _PACK).reshape(1, _PACK * out_f)
    return w_exp, b_exp


def _dense_path(x2d, w_exp, b_exp, *, block_rows):
    """y2d = per-128-row-pack linear, lane-dense. x2d: (R, 128*IN) f32."""
    rows, c_in = x2d.shape
    c_out = w_exp.shape[1]
    if rows <= block_rows:
        # Whole problem fits one tile: no grid, no pipeline overhead.
        return pl.pallas_call(
            _dense_linear_kernel,
            out_shape=jax.ShapeDtypeStruct((rows, c_out), x2d.dtype),
            in_specs=[pl.BlockSpec(memory_space=pltpu.MemorySpace.VMEM)] * 3,
            out_specs=pl.BlockSpec(memory_space=pltpu.MemorySpace.VMEM),
        )(x2d, w_exp, b_exp)

    # Large batch: tile only the row axis.  512 x 384 in (768 KiB) +
    # 512 x 256 out (512 KiB), double-buffered, + 384 KiB resident weight
    # fits comfortably under every generation's scoped-VMEM default
    # (v5e 16 MiB, v6e/v7x 32 MiB).  "parallel" lets v7x's two TCs split it.
    grid = (pl.cdiv(rows, block_rows),)
    return pl.pallas_call(
        _dense_linear_kernel,
        out_shape=jax.ShapeDtypeStruct((rows, c_out), x2d.dtype),
        grid=grid,
        in_specs=[
            pl.BlockSpec((block_rows, c_in), lambda i: (i, 0)),
            pl.BlockSpec((w_exp.shape[0], c_out), lambda i: (0, 0)),
            pl.BlockSpec((1, c_out), lambda i: (0, 0)),
        ],
        out_specs=pl.BlockSpec((block_rows, c_out), lambda i: (i, 0)),
        compiler_params=pltpu.CompilerParams(
            dimension_semantics=("parallel",)),
    )(x2d, w_exp, b_exp)


def _tail_path(x, weight, bias):
    """Linear for a small (<128-row) remainder, weights/bias as SMEM scalars."""
    rows = x.shape[0]
    out_f = weight.shape[0]
    return pl.pallas_call(
        _tail_linear_kernel,
        out_shape=jax.ShapeDtypeStruct((rows, out_f), x.dtype),
        in_specs=[
            pl.BlockSpec(memory_space=pltpu.MemorySpace.VMEM),
            pl.BlockSpec(memory_space=pltpu.MemorySpace.SMEM),
            pl.BlockSpec(memory_space=pltpu.MemorySpace.SMEM),
        ],
        out_specs=pl.BlockSpec(memory_space=pltpu.MemorySpace.VMEM),
    )(x, weight, bias)


def simple_model_forward(x, weight, bias, *, block_rows=512):
    """y = x @ weight.T + bias, matching PyTorch nn.Linear(3, 2)."""
    B, in_f = x.shape
    out_f, in_f_w = weight.shape
    assert in_f == in_f_w and bias.shape == (out_f,)

    b_main = (B // _PACK) * _PACK  # largest 128-row-multiple prefix
    pieces = []
    if b_main > 0:
        w_exp, b_exp = _expand_params(weight, bias)
        # Pure row-major reshapes of contiguous data: no transpose, no copy.
        x2d = x[:b_main].reshape(b_main // _PACK, _PACK * in_f)
        y2d = _dense_path(x2d, w_exp, b_exp, block_rows=block_rows)
        pieces.append(y2d.reshape(b_main, out_f))
    if B > b_main:
        pieces.append(_tail_path(x[b_main:], weight, bias))
    return pieces[0] if len(pieces) == 1 else jnp.concatenate(pieces, axis=0)


if __name__ == "__main__":
    # Deterministic parameters, exactly as in SimpleModel.__init__
    weight = jnp.array([[1.0, 2.0, 0.0],
                        [0.0, 0.0, 0.0]], dtype=jnp.float32)   # (2, 3)
    bias = jnp.array([0.1, -0.1], dtype=jnp.float32)           # (2,)

    # Small deterministic input: 3 full 128-row packs (dense MXU path)
    # plus a 5-row tail (VPU fallback path).
    key = jax.random.PRNGKey(0)
    B = 389
    x = jax.random.normal(key, (B, 3), dtype=jnp.float32)

    y = simple_model_forward(x, weight, bias)
    jax.block_until_ready(y)

    # Sanity check against plain-JAX reference of the PyTorch forward
    y_ref = x @ weight.T + bias
    assert y.shape == y_ref.shape
    assert jnp.allclose(y, y_ref, atol=1e-5), (y, y_ref)

    print("KERNEL_OK")
</pallas_src>

<mosaic_0001>
module attributes {stable_mosaic.version = 11 : i64} {
  func.func @_dense_linear_kernel(%arg0: memref<3x384xf32, #tpu.memory_space<vmem>>, %arg1: memref<384x256xf32, #tpu.memory_space<vmem>>, %arg2: memref<1x256xf32, #tpu.memory_space<vmem>>, %arg3: memref<3x256xf32, #tpu.memory_space<vmem>>) attributes {dimension_semantics = [], scalar_prefetch = 0 : i64, scratch_operands = 0 : i64, tpu.core_type = #tpu.core_type<tc>} {
    %c0 = arith.constant 0 : index
    %c0_0 = arith.constant 0 : index
    %0 = vector.load %arg0[%c0, %c0_0] : memref<3x384xf32, #tpu.memory_space<vmem>>, vector<3x384xf32>
    %c0_1 = arith.constant 0 : index
    %c0_2 = arith.constant 0 : index
    %1 = vector.load %arg1[%c0_1, %c0_2] : memref<384x256xf32, #tpu.memory_space<vmem>>, vector<384x256xf32>
    %cst = arith.constant dense<0.000000e+00> : vector<3x256xf32>
    %2 = tpu.matmul %0, %1, %cst {dimension_numbers = #tpu.dot_dimension_numbers<[1], [0], [0], [1], [0, 0, 1, 1], [], []>, precision = #tpu.contract_precision<fp32>} : vector<3x384xf32>, vector<384x256xf32>, vector<3x256xf32> -> vector<3x256xf32>
    %c0_3 = arith.constant 0 : index
    %c0_4 = arith.constant 0 : index
    %3 = vector.load %arg2[%c0_3, %c0_4] : memref<1x256xf32, #tpu.memory_space<vmem>>, vector<1x256xf32>
    %4 = vector.broadcast %3 : vector<1x256xf32> to vector<3x256xf32>
    %5 = arith.addf %2, %4 : vector<3x256xf32>
    %c0_5 = arith.constant 0 : index
    %c0_6 = arith.constant 0 : index
    %6 = vector.load %arg3[%c0_5, %c0_6] : memref<3x256xf32, #tpu.memory_space<vmem>>, vector<3x256xf32>
    tpu.vector_store %arg3[%c0_5, %c0_6], %5 {strides = array<i32>} : memref<3x256xf32, #tpu.memory_space<vmem>>, vector<3x256xf32>,
    return
  }
}

</mosaic_0001>

<bundles_post_ra>
// kernel: tpu_custom_call.1
= control target key start
LH: loop header
LB: loop body
LE: loop exit
PB: predicated region body
PF: predicated region fallthrough
CT: control target
= control target key end

     0   :  { %8 = vsyncpa [#allocation3], 0  ;;  %s4184_s0 = inlined_call_operand.hbm [shape: f32[3,384], index: 0, kind: input, shape index: {}]   ;;  %s4185_s1 = inlined_call_operand.hbm [shape: f32[384,256], index: 1, kind: input, shape index: {}]   ;;  %s4186_s2 = inlined_call_operand.vmem [shape: f32[1,256], index: 2, kind: input, shape index: {}]   ;;  %s4187_s3 = inlined_call_operand.hbm [shape: f32[3,256], index: 3, kind: output, shape index: {}]  }
   0x1   :  { %9 = vsyncpa [#allocation6], 0 }
   0x2   :  { %10 = vsyncpa [#allocation4], 0  ;;  %s2387_s12 = smov [#allocation2]   ;;  %s2388_s14 = smov [#allocation5]  }
   0x3   :  { %s17_s13 = sshll.u32 %s2387_s12, 4  ;;  %s26_s15 = sshll.u32 %s2388_s14, 4  ;;  %s18_s13 = int_to_ptr.vmem [resolvable:$true] %s17_s13  ;;  %s27_s15 = int_to_ptr.vmem [resolvable:$true] %s26_s15 }
   0x4   :  { %s2329_s16 = scalar_lea.vmem %s18_s13, 192  ;;  %p2334_p1 = scmp.lt.s32.totalorder %s18_s13, %s18_s13 }
   0x5   :  { %p2330_p0 = scmp.ne.s32.totalorder %s18_s13, %s2329_s16  ;;  %p2335_p2 = scmp.lt.s32.totalorder %s2329_s16, %s2329_s16 }
   0x7   :  { %p2336_p3 = por %p2335_p2, %p2334_p1 }
   0x9   :  { %p2337_p4 = pnand %p2336_p3, %p2330_p0 }
   0xb   :  { %2340 = shalt.err (!%p2337_p4)
}
   0xc   :  { %20 = dma.hbm_to_vmem [thread:$0]  %s4184_s0, 192, %s18_s13, [#allocation3]  }
   0xd   :  { %s2349_s19 = scalar_lea.vmem %s27_s15, 12288  ;;  %p2354_p6 = scmp.lt.s32.totalorder %s27_s15, %s27_s15 }
   0xe   :  { %p2350_p5 = scmp.ne.s32.totalorder %s27_s15, %s2349_s19  ;;  %p2355_p7 = scmp.lt.s32.totalorder %s2349_s19, %s2349_s19 }
  0x10   :  { %p2356_p8 = por %p2355_p7, %p2354_p6 }
  0x12   :  { %p2357_p9 = pnand %p2356_p8, %p2350_p5 }
  0x14   :  { %2360 = shalt.err (!%p2357_p9)
}
  0x15   :  { %s2389_s20 = smov 256   ;;  %s2390_s21 = smov 16  }
  0x16   :  { %32 = dma.hbm_to_vmem [thread:$0]  %s4185_s1, 12288, %s27_s15, [#allocation6], %s2389_s20, %s2389_s20, %s2390_s21  }
  0x17   :  { %2381 = dma.done.wait [#allocation3], 192  }
  0x18   :  { %2382 = vsyncadd [#allocation3], 4294967104 }
  0x19   :  { %2383 = dma.done.wait [#allocation6], 12288  }
  0x1a   :  { %2384 = vsyncadd [#allocation6], 4294955008  ;;  %v74_v0 = vld [vmem:[#allocation5 + $0xf8] sm:$0xff]  ;;  %v73_v1 = vld [vmem:[#allocation5 + $0xf0] sm:$0xff] }
  0x1b   :  { %v72_v2 = vld [vmem:[#allocation5 + $0xe8] sm:$0xff]  ;;  %v2419_v3 = vand.u32 4294901760, %v74_v0  ;;  %v2421_v4 = vand.u32 4294901760, %v73_v1  ;;  %v71_v6 = vld [vmem:[#allocation5 + $0xe0] sm:$0xff]  ;;  %v70_v7 = vld [vmem:[#allocation5 + $0xd8] sm:$0xff] }
  0x1c   :  { %v2423_v5 = vand.u32 4294901760, %v72_v2  ;;  %v69_v8 = vld [vmem:[#allocation5 + $0xd0] sm:$0xff]  ;;  %v2425_v9 = vand.u32 4294901760, %v71_v6  ;;  %v2427_v10 = vand.u32 4294901760, %v70_v7  ;;  %v68_v12 = vld [vmem:[#allocation5 + $0xc8] sm:$0xff]  ;;  %v67_v13 = vld [vmem:[#allocation5 + $0xc0] sm:$0xff] }
  0x1d   :  { %v2429_v11 = vand.u32 4294901760, %v69_v8  ;;  %v66_v14 = vld [vmem:[#allocation5 + $0xb8] sm:$0xff]  ;;  %155 = vmatprep.subr.mxu0 %v2419_v3  ;;  %v2432_v15 = vand.u32 4294901760, %v68_v12  ;;  %v2434_v16 = vand.u32 4294901760, %v67_v13  ;;  %v2439_v18 = vsub.f32 %v74_v0, %v2419_v3  ;;  %v2441_v19 = vld [vmem:[#allocation5 + $0xb0] sm:$0xff]  ;;  %v2443_v20 = vld [vmem:[#allocation5 + $0xa8] sm:$0xff] }
  0x1e   :  { %v2436_v17 = vand.u32 4294901760, %v66_v14  ;;  %v2445_v21 = vld [vmem:[#allocation5 + $0xa0] sm:$0xff]  ;;  %157 = vmatpush1.msra.mxu0 %v2421_v4  ;;  %v2449_v22 = vand.u32 4294901760, %v2441_v19  ;;  %v2452_v23 = vsub.f32 %v73_v1, %v2421_v4  ;;  %v2455_v24 = vand.u32 4294901760, %v2443_v20  ;;  %v2460_v26 = vld [vmem:[#allocation5 + $0x98] sm:$0xff]  ;;  %v2462_v27 = vld [vmem:[#allocation5 + $0x90] sm:$0xff] }
  0x1f   :  { %4459 = vst [vmem:[#allocation11_spill] sm:$0xff] %v2439_v18  ;;  %v2458_v25 = vsub.f32 %v72_v2, %v2423_v5  ;;  %v2464_v28 = vld [vmem:[#allocation5 + $0x88] sm:$0xff]  ;;  %159 = vmatprep.subr.mxu0 %v2423_v5  ;;  %v4201_v29 = vand.u32 4294901760, %v2439_v18  ;;  %v2469_v30 = vand.u32 4294901760, %v2445_v21  ;;  %v2472_v31 = vsub.f32 %v71_v6, %v2425_v9  ;;  %v2486_v37 = vld [vmem:[#allocation5 + $0x80] sm:$0xff]  ;;  %v2510_v46 = vld [vmem:[#allocation5 + $0x78] sm:$0xff] }
  0x20   :  { %v2475_v32 = vand.u32 4294901760, %v2460_v26  ;;  %161 = vmatpush1.msra.mxu0 %v2425_v9  ;;  %v4199_v33 = vand.u32 4294901760, %v2452_v23  ;;  %v2481_v35 = vsub.f32 %v70_v7, %v2427_v10  ;;  %v2484_v36 = vand.u32 4294901760, %v2462_v27  ;;  %v2520_v51 = vld [vmem:[#allocation5 + $0x70] sm:$0xff]  ;;  %v2527_v56 = vld [vmem:[#allocation5 + $0x68] sm:$0xff]  ;;  %v2539_v61 = vld [vmem:[#allocation5 + $0x60] sm:$0xff] }
  0x21   :  { %4460 = vst [vmem:[#allocation12_spill] sm:$0xff] %v2469_v30  ;;  %v4198_v34 = vand.u32 4294901760, %v2458_v25  ;;  %163 = vmatprep.subr.mxu0 %v2427_v10  ;;  %v302_v38 = vsub.f32 %v2439_v18, %v4201_v29  ;;  %v4196_v39 = vand.u32 4294901760, %v2472_v31  ;;  %v2494_v40 = vsub.f32 %v69_v8, %v2429_v11  ;;  %v2551_v2 = vld [vmem:[#allocation5 + $0x58] sm:$0xff] }
  0x22   :  { %4461 = vst [vmem:[#allocation13_spill] sm:$0xff] %v2475_v32  ;;  %4462 = vst [vmem:[#allocation14_spill] sm:$0xff] %v2484_v36  ;;  %v2497_v41 = vand.u32 4294901760, %v2464_v28  ;;  %165 = vmatpush1.msra.mxu0 %v2429_v11  ;;  %v308_v42 = vsub.f32 %v2452_v23, %v4199_v33  ;;  %v4194_v44 = vand.u32 4294901760, %v2481_v35  ;;  %v2508_v45 = vsub.f32 %v68_v12, %v2432_v15 }
  0x23   :  { %v314_v43 = vsub.f32 %v2458_v25, %v4198_v34  ;;  %167 = vmatprep.subr.mxu0 %v2432_v15  ;;  %v303_v47 = vand.u32 4294901760, %v302_v38  ;;  %v320_v48 = vsub.f32 %v2472_v31, %v4196_v39  ;;  %v4193_v49 = vand.u32 4294901760, %v2494_v40  ;;  %v2642_v39 = vld [vmem:[#allocation5 + $0x28] sm:$0xff]  ;;  %v2652_v34 = vld [vmem:[#allocation5 + $0x20] sm:$0xff] }
  0x24   :  { %4463 = vst [vmem:[#allocation15_spill] sm:$0xff] %v2497_v41  ;;  %v2518_v50 = vand.u32 4294901760, %v2486_v37  ;;  %169 = vmatpush1.msra.mxu0 %v2434_v16  ;;  %v309_v52 = vand.u32 4294901760, %v308_v42  ;;  %v326_v54 = vsub.f32 %v2481_v35, %v4194_v44  ;;  %v4191_v55 = vand.u32 4294901760, %v2508_v45 }
  0x25   :  { %v315_v53 = vand.u32 4294901760, %v314_v43  ;;  %171 = vmatprep.subr.mxu0 %v2436_v17  ;;  %304 = vmatprep.subr.mxu1 %v303_v47  ;;  %v321_v57 = vand.u32 4294901760, %v320_v48  ;;  %v332_v58 = vsub.f32 %v2494_v40, %v4193_v49  ;;  %v2534_v59 = vsub.f32 %v67_v13, %v2434_v16  ;;  %v2562_v13 = vld [vmem:[#allocation5 + $0x50] sm:$0xff] }
  0x26   :  { %4464 = vst [vmem:[#allocation16_spill] sm:$0xff] %v2518_v50  ;;  %v2537_v60 = vand.u32 4294901760, %v2510_v46  ;;  %173 = vmatpush1.msra.mxu0 %v2449_v22  ;;  %310 = vmatpush1.msra.mxu1 %v309_v52  ;;  %v327_v62 = vand.u32 4294901760, %v326_v54  ;;  %v338_v63 = vsub.f32 %v2508_v45, %v4191_v55  ;;  %v2546_v0 = vsub.f32 %v66_v14, %v2436_v17  ;;  %v2629_v49 = vld [vmem:[#allocation5 + $0x30] sm:$0xff] }
  0x27   :  { %v2549_v1 = vand.u32 4294901760, %v2520_v51  ;;  %175 = vmatprep.subr.mxu0 %v2455_v24  ;;  %316 = vmatprep.subr.mxu1 %v315_v53  ;;  %v333_v6 = vand.u32 4294901760, %v332_v58  ;;  %v4189_v7 = vand.u32 4294901760, %v2534_v59  ;;  %v2557_v8 = vsub.f32 %v2441_v19, %v2449_v22 }
  0x28   :  { %4465 = vst [vmem:[#allocation17_spill] sm:$0xff] %v2537_v60  ;;  %v2560_v12 = vand.u32 4294901760, %v2527_v56  ;;  %177 = vmatpush1.msra.mxu0 %v2469_v30  ;;  %322 = vmatpush1.msra.mxu1 %v321_v57  ;;  %v339_v14 = vand.u32 4294901760, %v338_v63  ;;  %v4188_v38 = vand.u32 4294901760, %v2546_v0  ;;  %v2568_v42 = vsub.f32 %v2443_v20, %v2455_v24  ;;  %v2585_v20 = vld [vmem:[#allocation5 + $0x48] sm:$0xff] }
  0x29   :  { %4466 = vst [vmem:[#allocation18_spill] sm:$0xff] %v2549_v1  ;;  %v2571_v43 = vand.u32 4294901760, %v2539_v61  ;;  %179 = vmatprep.subr.mxu0 %v2475_v32  ;;  %328 = vmatprep.subr.mxu1 %v327_v62  ;;  %v344_v19 = vsub.f32 %v2534_v59, %v4189_v7  ;;  %v4190_v47 = vand.u32 4294901760, %v2557_v8  ;;  %v2580_v48 = vsub.f32 %v2445_v21, %v2469_v30 }
  0x2a   :  { %4467 = vst [vmem:[#allocation19_spill] sm:$0xff] %v2560_v12  ;;  %v2583_v52 = vand.u32 4294901760, %v2551_v2  ;;  %181 = vmatpush1.msra.mxu0 %v2484_v36  ;;  %334 = vmatpush1.msra.mxu1 %v333_v6  ;;  %v350_v53 = vsub.f32 %v2546_v0, %v4188_v38  ;;  %v4192_v54 = vand.u32 4294901760, %v2568_v42  ;;  %v2594_v57 = vsub.f32 %v2460_v26, %v2475_v32  ;;  %v2608_v38 = vld [vmem:[#allocation5 + $0x40] sm:$0xff] }
  0x2b   :  { %4468 = vst [vmem:[#allocation20_spill] sm:$0xff] %v2571_v43  ;;  %v2597_v21 = vand.u32 4294901760, %v2562_v13  ;;  %183 = vmatprep.subr.mxu0 %v2497_v41  ;;  %340 = vmatprep.subr.mxu1 %v339_v14  ;;  %v345_v58 = vand.u32 4294901760, %v344_v19  ;;  %v356_v62 = vsub.f32 %v2557_v8, %v4190_v47  ;;  %v4195_v63 = vand.u32 4294901760, %v2580_v48  ;;  %v2618_v47 = vld [vmem:[#allocation5 + $0x38] sm:$0xff] }
  0x2c   :  { %4469 = vst [vmem:[#allocation21_spill] sm:$0xff] %v2583_v52  ;;  %v2606_v6 = vsub.f32 %v2462_v27, %v2484_v36  ;;  %185 = vmatpush1.msra.mxu0 %v2518_v50  ;;  %v351_v26 = vand.u32 4294901760, %v350_v53  ;;  %v362_v14 = vsub.f32 %v2568_v42, %v4192_v54  ;;  %v4197_v19 = vand.u32 4294901760, %v2594_v57  ;;  %v2732_v36 = vld [vmem:[#allocation5 + $0x1f8] sm:$0xff] }
  0x2d   :  { %4470 = vst [vmem:[#allocation22_spill] sm:$0xff] %v2597_v21  ;;  %v2616_v7 = vand.u32 4294901760, %v2585_v20  ;;  %346 = vmatpush1.msra.mxu1 %v345_v58  ;;  %187 = vmatprep.subr.mxu0 %v2537_v60  ;;  %v357_v27 = vand.u32 4294901760, %v356_v62  ;;  %v368_v55 = vsub.f32 %v2580_v48, %v4195_v63  ;;  %v2627_v54 = vsub.f32 %v2464_v28, %v2497_v41 }
  0x2e   :  { %v4200_v53 = vand.u32 4294901760, %v2606_v6  ;;  %352 = vmatprep.subr.mxu1 %v351_v26  ;;  %189 = vmatpush1.msra.mxu0 %v2549_v1  ;;  %v363_v44 = vand.u32 4294901760, %v362_v14  ;;  %v374_v58 = vsub.f32 %v2594_v57, %v4197_v19  ;;  %v2636_v62 = vand.u32 4294901760, %v2608_v38 }
  0x2f   :  { %4471 = vst [vmem:[#allocation23_spill] sm:$0xff] %v2616_v7  ;;  %v2640_v63 = vsub.f32 %v2486_v37, %v2518_v50  ;;  %358 = vmatpush1.msra.mxu1 %v357_v27  ;;  %191 = vmatprep.subr.mxu0 %v2560_v12  ;;  %v369_v28 = vand.u32 4294901760, %v368_v55  ;;  %v4204_v14 = vand.u32 4294901760, %v2627_v54  ;;  %v2650_v19 = vand.u32 4294901760, %v2618_v47 }
  0x30   :  { %4472 = vst [vmem:[#allocation24_spill] sm:$0xff] %v2636_v62  ;;  %v380_v26 = vsub.f32 %v2606_v6, %v4200_v53  ;;  %364 = vmatprep.subr.mxu1 %v363_v44  ;;  %193 = vmatpush1.msra.mxu0 %v2571_v43  ;;  %v375_v37 = vand.u32 4294901760, %v374_v58  ;;  %v2658_v55 = vsub.f32 %v2510_v46, %v2537_v60  ;;  %v2661_v33 = vand.u32 4294901760, %v2629_v49  ;;  %v2663_v53 = vld [vmem:[#allocation5 + $0x18] sm:$0xff] }
  0x31   :  { %4473 = vst [vmem:[#allocation25_spill] sm:$0xff] %v2650_v19  ;;  %v4207_v27 = vand.u32 4294901760, %v2640_v63  ;;  %370 = vmatpush1.msra.mxu1 %v369_v28  ;;  %195 = vmatprep.subr.mxu0 %v2583_v52  ;;  %v386_v44 = vsub.f32 %v2627_v54, %v4204_v14  ;;  %v2671_v58 = vsub.f32 %v2520_v51, %v2549_v1  ;;  %v2674_v46 = vand.u32 4294901760, %v2642_v39  ;;  %v2688_v51 = vld [vmem:[#allocation5 + $0x10] sm:$0xff] }
  0x32   :  { %4474 = vst [vmem:[#allocation26_spill] sm:$0xff] %v2661_v33  ;;  %v381_v29 = vand.u32 4294901760, %v380_v26  ;;  %376 = vmatprep.subr.mxu1 %v375_v37  ;;  %197 = vmatpush1.msra.mxu0 %v2597_v21  ;;  %v2683_v60 = vsub.f32 %v2527_v56, %v2560_v12  ;;  %v2686_v14 = vand.u32 4294901760, %v2652_v34  ;;  %v2697_v26 = vand.u32 4294901760, %v2663_v53  ;;  %v2699_v56 = vld [vmem:[#allocation5 + $0x8] sm:$0xff] }
  0x33   :  { %4475 = vst [vmem:[#allocation27_spill] sm:$0xff] %v2674_v46  ;;  %v392_v28 = vsub.f32 %v2640_v63, %v4207_v27  ;;  %199 = vmatprep.subr.mxu0 %v2616_v7  ;;  %v387_v37 = vand.u32 4294901760, %v386_v44  ;;  %v2694_v27 = vsub.f32 %v2539_v61, %v2571_v43  ;;  %v4480_v50 = vand.u32 4294901760, %v2658_v55  ;;  %v2722_v44 = vld [vmem:[#allocation5] sm:$0xff] }
  0x34   :  { %4476 = vst [vmem:[#allocation28_spill] sm:$0xff] %v2683_v60  ;;  %4477 = vst [vmem:[#allocation29_spill] sm:$0xff] %v2686_v14  ;;  %382 = vmatpush1.msra.mxu1 %v381_v29  ;;  %201 = vmatpush1.msra.mxu0 %v2636_v62  ;;  %v2708_v1 = vsub.f32 %v2551_v2, %v2583_v52  ;;  %v4482_v61 = vand.u32 4294901760, %v2671_v58  ;;  %v2730_v41 = vand.u32 4294901760, %v2699_v56 }
  0x35   :  { %4478 = vst [vmem:[#allocation30_spill] sm:$0xff] %v2694_v27  ;;  %4479 = vst [vmem:[#allocation31_spill] sm:$0xff] %v2697_v26  ;;  %v393_v12 = vand.u32 4294901760, %v392_v28  ;;  %v398_v29 = vsub.f32 %v2658_v55, %v4480_v50  ;;  %388 = vmatprep.subr.mxu1 %v387_v37  ;;  %203 = vmatprep.subr.mxu0 %v2650_v19  ;;  %v2716_v28 = vand.u32 4294901760, %v2688_v51  ;;  %v4485_v37 = vand.u32 4294901760, %v2683_v60 }
  0x36   :  { %4481 = vst [vmem:[#allocation32_spill] sm:$0xff] %v2708_v1  ;;  %v404_v43 = vsub.f32 %v2671_v58, %v4482_v61  ;;  %v2720_v50 = vsub.f32 %v2562_v13, %v2597_v21  ;;  %205 = vmatpush1.msra.mxu0 %v2661_v33  ;;  %4486 = vst [vmem:[#allocation35_spill] sm:$0xff] %v2730_v41  ;;  %v4487_v13 = vand.u32 4294901760, %v2694_v27 }
  0x37   :  { %4483 = vst [vmem:[#allocation33_spill] sm:$0xff] %v2716_v28  ;;  %394 = vmatpush1.msra.mxu1 %v393_v12  ;;  %v399_v2 = vand.u32 4294901760, %v398_v29  ;;  %v410_v52 = vsub.f32 %v2683_v60, %v4485_v37  ;;  %207 = vmatprep.subr.mxu0 %v2674_v46  ;;  %v2741_v21 = vsub.f32 %v2585_v20, %v2616_v7  ;;  %v2743_v37 = vld [vmem:[#allocation5 + $0x1f0] sm:$0xff]  ;;  %v2750_v60 = vand.u32 4294901760, %v2722_v44  ;;  %v2756_v29 = vld [vmem:[#allocation5 + $0x1e8] sm:$0xff] }
  0x38   :  { %4484 = vst [vmem:[#allocation34_spill] sm:$0xff] %v2720_v50  ;;  %v405_v32 = vand.u32 4294901760, %v404_v43  ;;  %v416_v12 = vsub.f32 %v2694_v27, %v4487_v13  ;;  %209 = vmatpush1.msra.mxu0 %v2686_v14  ;;  %v4489_v43 = vand.u32 4294901760, %v2708_v1  ;;  %v2754_v13 = vsub.f32 %v2608_v38, %v2636_v62 }
  0x39   :  { %4488 = vst [vmem:[#allocation36_spill] sm:$0xff] %v2741_v21  ;;  %400 = vmatprep.subr.mxu1 %v399_v2  ;;  %v411_v61 = vand.u32 4294901760, %v410_v52  ;;  %4490 = vst [vmem:[#allocation37_spill] sm:$0xff] %v2750_v60  ;;  %211 = vmatprep.subr.mxu0 %v2697_v26  ;;  %v4492_v52 = vand.u32 4294901760, %v2720_v50  ;;  %v2775_v62 = vand.u32 4294901760, %v2743_v37 }
  0x3a   :  { %v422_v30 = vsub.f32 %v2708_v1, %v4489_v43  ;;  %4491 = vst [vmem:[#allocation38_spill] sm:$0xff] %v2754_v13  ;;  %406 = vmatpush1.msra.mxu1 %v405_v32  ;;  %v417_v20 = vand.u32 4294901760, %v416_v12  ;;  %v2764_v43 = vand.u32 4294901760, %v2732_v36  ;;  %v2766_v1 = vld [vmem:[#allocation5 + $0x1e0] sm:$0xff]  ;;  %213 = vmatpush1.msra.mxu0 %v2716_v28  ;;  %v2772_v12 = vsub.f32 %v2618_v47, %v2650_v19 }
  0x3b   :  { %v428_v2 = vsub.f32 %v2720_v50, %v4492_v52  ;;  %412 = vmatprep.subr.mxu1 %v411_v61  ;;  %4495 = vst [vmem:[#allocation41_spill] sm:$0xff] %v2775_v62  ;;  %v2777_v52 = vld [vmem:[#allocation5 + $0x1d8] sm:$0xff]  ;;  %215 = vmatprep.subr.mxu0 %v2730_v41  ;;  %v4496_v61 = vand.u32 4294901760, %v2741_v21  ;;  %v2785_v32 = vsub.f32 %v2629_v49, %v2661_v33  ;;  %v2788_v47 = vand.u32 4294901760, %v2756_v29  ;;  %v2802_v49 = vld [vmem:[#allocation5 + $0x1d0] sm:$0xff] }
  0x3c   :  { %4493 = vst [vmem:[#allocation39_spill] sm:$0xff] %v2764_v43  ;;  %v423_v38 = vand.u32 4294901760, %v422_v30  ;;  %4494 = vst [vmem:[#allocation40_spill] sm:$0xff] %v2772_v12  ;;  %418 = vmatpush1.msra.mxu1 %v417_v20  ;;  %217 = vmatpush1.msra.mxu0 %v2750_v60  ;;  %v4499_v19 = vand.u32 4294901760, %v2754_v13  ;;  %v2797_v50 = vsub.f32 %v2642_v39, %v2674_v46  ;;  %v2813_v39 = vld [vmem:[#allocation5 + $0x1c8] sm:$0xff] }
  0x3d   :  { %v429_v7 = vand.u32 4294901760, %v428_v2  ;;  %v434_v30 = vsub.f32 %v2741_v21, %v4496_v61  ;;  %4497 = vst [vmem:[#allocation42_spill] sm:$0xff] %v2785_v32  ;;  %4498 = vst [vmem:[#allocation43_spill] sm:$0xff] %v2788_v47  ;;  %v2800_v61 = vand.u32 4294901760, %v2766_v1  ;;  %219 = vmatprep.subr.mxu0 %v2764_v43  ;;  %v2811_v2 = vand.u32 4294901760, %v2777_v52 }
  0x3e   :  { %424 = vmatprep.subr.mxu1 %v423_v38  ;;  %v440_v20 = vsub.f32 %v2754_v13, %v4499_v19  ;;  %4500 = vst [vmem:[#allocation44_spill] sm:$0xff] %v2797_v50  ;;  %v4250_v38 = vand.u32 4294901760, %v2785_v32  ;;  %v2808_v19 = vsub.f32 %v2652_v34, %v2686_v14  ;;  %v4504_v13 = vand.u32 4294901760, %v2772_v12  ;;  %221 = vmatpush2.msra.mxu0 %v2775_v62 }
  0x3f   :  { %4501 = vst [vmem:[#allocation45_spill] sm:$0xff] %v2800_v61  ;;  %430 = vmatpush1.msra.mxu1 %v429_v7  ;;  %v435_v33 = vand.u32 4294901760, %v434_v30  ;;  %4503 = vst [vmem:[#allocation47_spill] sm:$0xff] %v2811_v2  ;;  %v2822_v30 = vsub.f32 %v2663_v53, %v2697_v26  ;;  %223 = vmatprep.subr.mxu0 %v2788_v47  ;;  %v2830_v14 = vand.u32 4294901760, %v2802_v49  ;;  %v2836_v7 = vld [vmem:[#allocation5 + $0x1c0] sm:$0xff] }
  0x40   :  { %4502 = vst [vmem:[#allocation46_spill] sm:$0xff] %v2808_v19  ;;  %v441_v46 = vand.u32 4294901760, %v440_v20  ;;  %v446_v21 = vsub.f32 %v2772_v12, %v4504_v13  ;;  %v452_v34 = vsub.f32 %v2785_v32, %v4250_v38  ;;  %v2834_v13 = vsub.f32 %v2688_v51, %v2716_v28  ;;  %225 = vmatpush2.msra.mxu0 %v2800_v61  ;;  %v2846_v32 = vld [vmem:[#allocation5 + $0x1b8] sm:$0xff] }
  0x41   :  { %4505 = vst [vmem:[#allocation48_spill] sm:$0xff] %v2822_v30  ;;  %436 = vmatprep.subr.mxu1 %v435_v33  ;;  %4506 = vst [vmem:[#allocation49_spill] sm:$0xff] %v2830_v14  ;;  %v4508_v33 = vand.u32 4294901760, %v2797_v50  ;;  %v2844_v20 = vand.u32 4294901760, %v2813_v39  ;;  %v4510_v51 = vand.u32 4294901760, %v2808_v19  ;;  %227 = vmatprep.subr.mxu0 %v2811_v2 }
  0x42   :  { %4507 = vst [vmem:[#allocation50_spill] sm:$0xff] %v2834_v13  ;;  %442 = vmatpush1.msra.mxu1 %v441_v46  ;;  %v447_v53 = vand.u32 4294901760, %v446_v21  ;;  %v453_v12 = vand.u32 4294901760, %v452_v34  ;;  %v2855_v46 = vsub.f32 %v2699_v56, %v2730_v41  ;;  %229 = vmatpush2.msra.mxu0 %v2830_v14  ;;  %v2868_v21 = vsub.f32 %v2722_v44, %v2750_v60  ;;  %v2891_v60 = vld [vmem:[#allocation5 + $0x198] sm:$0xff] }
  0x43   :  { %v458_v26 = vsub.f32 %v2797_v50, %v4508_v33  ;;  %4509 = vst [vmem:[#allocation51_spill] sm:$0xff] %v2844_v20  ;;  %v464_v28 = vsub.f32 %v2808_v19, %v4510_v51  ;;  %v2857_v33 = vld [vmem:[#allocation5 + $0x1b0] sm:$0xff]  ;;  %v4512_v50 = vand.u32 4294901760, %v2822_v30  ;;  %v2864_v51 = vand.u32 4294901760, %v2836_v7  ;;  %v2870_v19 = vld [vmem:[#allocation5 + $0x1a8] sm:$0xff]  ;;  %231 = vmatprep.subr.mxu0 %v2844_v20 }
  0x44   :  { %4511 = vst [vmem:[#allocation52_spill] sm:$0xff] %v2855_v46  ;;  %448 = vmatprep.subr.mxu1 %v447_v53  ;;  %4514 = vst [vmem:[#allocation54_spill] sm:$0xff] %v2868_v21  ;;  %v4515_v53 = vand.u32 4294901760, %v2834_v13  ;;  %v2878_v41 = vand.u32 4294901760, %v2846_v32 }
  0x45   :  { %v459_v38 = vand.u32 4294901760, %v458_v26  ;;  %v470_v34 = vsub.f32 %v2822_v30, %v4512_v50  ;;  %4513 = vst [vmem:[#allocation53_spill] sm:$0xff] %v2864_v51  ;;  %454 = vmatpush1.msra.mxu1 %v453_v12  ;;  %v465_v56 = vand.u32 4294901760, %v464_v28  ;;  %v2880_v30 = vld [vmem:[#allocation5 + $0x1a0] sm:$0xff]  ;;  %233 = vmatpush2.msra.mxu0 %v2864_v51  ;;  %v4273_v12 = vand.u32 4294901760, %v2868_v21 }
  0x46   :  { %v476_v26 = vsub.f32 %v2834_v13, %v4515_v53  ;;  %4516 = vst [vmem:[#allocation55_spill] sm:$0xff] %v2878_v41  ;;  %v2886_v28 = vsub.f32 %v2732_v36, %v2764_v43  ;;  %v2889_v53 = vand.u32 4294901760, %v2857_v33  ;;  %v4519_v13 = vand.u32 4294901760, %v2855_v46  ;;  %235 = vmatprep.subr.mxu0 %v2878_v41 }
  0x47   :  { %460 = vmatprep.subr.mxu1 %v459_v38  ;;  %v471_v44 = vand.u32 4294901760, %v470_v34  ;;  %v2899_v34 = vsub.f32 %v2743_v37, %v2775_v62  ;;  %v2902_v36 = vand.u32 4294901760, %v2870_v19  ;;  %v488_v43 = vsub.f32 %v2868_v21, %v4273_v12  ;;  %v2916_v37 = vld [vmem:[#allocation5 + $0x190] sm:$0xff] }
  0x48   :  { %4517 = vst [vmem:[#allocation56_spill] sm:$0xff] %v2886_v28  ;;  %4518 = vst [vmem:[#allocation57_spill] sm:$0xff] %v2889_v53  ;;  %466 = vmatpush1.msra.mxu1 %v465_v56  ;;  %v477_v50 = vand.u32 4294901760, %v476_v26  ;;  %v482_v38 = vsub.f32 %v2855_v46, %v4519_v13  ;;  %237 = vmatpush2.msra.mxu0 %v2889_v53  ;;  %v2911_v13 = vsub.f32 %v2756_v29, %v2788_v47  ;;  %v2927_v29 = vld [vmem:[#allocation5 + $0x188] sm:$0xff] }
  0x49   :  { %4520 = vst [vmem:[#allocation58_spill] sm:$0xff] %v2899_v34  ;;  %4521 = vst [vmem:[#allocation59_spill] sm:$0xff] %v2902_v36  ;;  %472 = vmatprep.subr.mxu1 %v471_v44  ;;  %v2914_v26 = vand.u32 4294901760, %v2880_v30  ;;  %v4284_v44 = vand.u32 4294901760, %v2899_v34  ;;  %239 = vmatprep.subr.mxu0 %v2902_v36  ;;  %v2922_v12 = vsub.f32 %v2766_v1, %v2800_v61  ;;  %v2925_v56 = vand.u32 4294901760, %v2891_v60 }
  0x4a   :  { %4522 = vst [vmem:[#allocation60_spill] sm:$0xff] %v2911_v13  ;;  %478 = vmatpush1.msra.mxu1 %v477_v50  ;;  %v483_v62 = vand.u32 4294901760, %v482_v38  ;;  %v489_v47 = vand.u32 4294901760, %v488_v43  ;;  %v4526_v21 = vand.u32 4294901760, %v2886_v28  ;;  %v2936_v38 = vsub.f32 %v2777_v52, %v2811_v2  ;;  %v2950_v50 = vld [vmem:[#allocation5 + $0x180] sm:$0xff] }
  0x4b   :  { %4523 = vst [vmem:[#allocation61_spill] sm:$0xff] %v2914_v26  ;;  %4524 = vst [vmem:[#allocation62_spill] sm:$0xff] %v2922_v12  ;;  %241 = vmatpush2.msra.mxu0 %v2914_v26  ;;  %v500_v1 = vsub.f32 %v2899_v34, %v4284_v44  ;;  %v2944_v43 = vand.u32 4294901760, %v2916_v37  ;;  %v2957_v61 = vand.u32 4294901760, %v2927_v29  ;;  %v2959_v34 = vld [vmem:[#allocation5 + $0x178] sm:$0xff]  ;;  %v4532_v27 = vand.u32 4294901760, %v2922_v12 }
  0x4c   :  { %4525 = vst [vmem:[#allocation63_spill] sm:$0xff] %v2925_v56  ;;  %v494_v46 = vsub.f32 %v2886_v28, %v4526_v21  ;;  %4527 = vst [vmem:[#allocation64_spill] sm:$0xff] %v2936_v38  ;;  %484 = vmatprep.subr.mxu1 %v483_v62  ;;  %243 = vmatprep.subr.mxu0 %v2925_v56  ;;  %v2948_v21 = vsub.f32 %v2802_v49, %v2830_v14  ;;  %v4530_v62 = vand.u32 4294901760, %v2911_v13 }
  0x4d   :  { %4528 = vst [vmem:[#allocation65_spill] sm:$0xff] %v2944_v43  ;;  %490 = vmatpush1.msra.mxu1 %v489_v47  ;;  %4531 = vst [vmem:[#allocation67_spill] sm:$0xff] %v2957_v61  ;;  %v501_v28 = vand.u32 4294901760, %v500_v1  ;;  %v512_v49 = vsub.f32 %v2922_v12, %v4532_v27  ;;  %245 = vmatpush2.msra.mxu0 %v2944_v43  ;;  %v4534_v14 = vand.u32 4294901760, %v2936_v38  ;;  %v2977_v27 = vand.u32 4294901760, %v2950_v50  ;;  %v2983_v12 = vld [vmem:[#allocation5 + $0x168] sm:$0xff] }
  0x4e   :  { %4529 = vst [vmem:[#allocation66_spill] sm:$0xff] %v2948_v21  ;;  %v495_v52 = vand.u32 4294901760, %v494_v46  ;;  %v506_v2 = vsub.f32 %v2911_v13, %v4530_v62  ;;  %v2968_v46 = vsub.f32 %v2813_v39, %v2844_v20  ;;  %v2970_v62 = vld [vmem:[#allocation5 + $0x170] sm:$0xff]  ;;  %247 = vmatprep.subr.mxu0 %v2957_v61  ;;  %v2981_v47 = vsub.f32 %v2836_v7, %v2864_v51 }
  0x4f   :  { %v518_v1 = vsub.f32 %v2936_v38, %v4534_v14  ;;  %4535 = vst [vmem:[#allocation69_spill] sm:$0xff] %v2977_v27  ;;  %v513_v39 = vand.u32 4294901760, %v512_v49  ;;  %v2990_v14 = vand.u32 4294901760, %v2959_v34  ;;  %v2992_v38 = vld [vmem:[#allocation5 + $0x160] sm:$0xff]  ;;  %249 = vmatpush2.msra.mxu0 %v2977_v27  ;;  %v3001_v49 = vand.u32 4294901760, %v2970_v62 }
  0x50   :  { %4533 = vst [vmem:[#allocation68_spill] sm:$0xff] %v2968_v46  ;;  %496 = vmatprep.subr.mxu1 %v495_v52  ;;  %v507_v44 = vand.u32 4294901760, %v506_v2  ;;  %4536 = vst [vmem:[#allocation70_spill] sm:$0xff] %v2981_v47  ;;  %v4537_v52 = vand.u32 4294901760, %v2948_v21  ;;  %v4307_v7 = vand.u32 4294901760, %v2981_v47  ;;  %v4541_v51 = vand.u32 4294901760, %v2968_v46 }
  0x51   :  { %502 = vmatpush2.msra.mxu1 %v501_v28  ;;  %4538 = vst [vmem:[#allocation71_spill] sm:$0xff] %v2990_v14  ;;  %v519_v13 = vand.u32 4294901760, %v518_v1  ;;  %v2998_v28 = vsub.f32 %v2846_v32, %v2878_v41  ;;  %4540 = vst [vmem:[#allocation73_spill] sm:$0xff] %v3001_v49  ;;  %251 = vmatprep.subr.mxu0 %v2990_v14  ;;  %v3011_v1 = vsub.f32 %v2857_v33, %v2889_v53  ;;  %v3028_v33 = vld [vmem:[#allocation5 + $0x150] sm:$0xff] }
  0x52   :  { %v524_v2 = vsub.f32 %v2948_v21, %v4537_v52  ;;  %508 = vmatprep.subr.mxu1 %v507_v44  ;;  %v3003_v52 = vld [vmem:[#allocation5 + $0x158] sm:$0xff]  ;;  %v530_v44 = vsub.f32 %v2968_v46, %v4541_v51  ;;  %v3014_v32 = vand.u32 4294901760, %v2983_v12  ;;  %v536_v41 = vsub.f32 %v2981_v47, %v4307_v7  ;;  %253 = vmatpush2.msra.mxu0 %v3001_v49 }
  0x53   :  { %4539 = vst [vmem:[#allocation72_spill] sm:$0xff] %v2998_v28  ;;  %514 = vmatpush2.msra.mxu1 %v513_v39  ;;  %4542 = vst [vmem:[#allocation74_spill] sm:$0xff] %v3011_v1  ;;  %v3023_v51 = vsub.f32 %v2870_v19, %v2902_v36  ;;  %v3034_v7 = vsub.f32 %v2880_v30, %v2914_v26  ;;  %v3037_v39 = vand.u32 4294901760, %v3003_v52  ;;  %v3039_v19 = vld [vmem:[#allocation5 + $0x148] sm:$0xff]  ;;  %v4548_v47 = vand.u32 4294901760, %v2998_v28 }
  0x54   :  { %v525_v20 = vand.u32 4294901760, %v524_v2  ;;  %4543 = vst [vmem:[#allocation75_spill] sm:$0xff] %v3014_v32  ;;  %520 = vmatprep.subr.mxu1 %v519_v13  ;;  %v3026_v2 = vand.u32 4294901760, %v2992_v38  ;;  %v531_v53 = vand.u32 4294901760, %v530_v44  ;;  %v4318_v13 = vand.u32 4294901760, %v3011_v1  ;;  %255 = vmatprep.subr.mxu0 %v3014_v32 }
  0x55   :  { %4544 = vst [vmem:[#allocation76_spill] sm:$0xff] %v3023_v51  ;;  %4546 = vst [vmem:[#allocation78_spill] sm:$0xff] %v3034_v7  ;;  %v537_v36 = vand.u32 4294901760, %v536_v41  ;;  %v542_v46 = vsub.f32 %v2998_v28, %v4548_v47  ;;  %v3048_v44 = vsub.f32 %v2891_v60, %v2925_v56  ;;  %v3056_v41 = vand.u32 4294901760, %v3028_v33 }
  0x56   :  { %4545 = vst [vmem:[#allocation77_spill] sm:$0xff] %v3026_v2  ;;  %526 = vmatpush2.msra.mxu1 %v525_v20  ;;  %4547 = vst [vmem:[#allocation79_spill] sm:$0xff] %v3037_v39  ;;  %257 = vmatpush2.msra.mxu0 %v3026_v2  ;;  %v548_v30 = vsub.f32 %v3011_v1, %v4318_v13  ;;  %v3060_v47 = vsub.f32 %v2916_v37, %v2944_v43  ;;  %v3062_v20 = vld [vmem:[#allocation5 + $0x140] sm:$0xff]  ;;  %v3069_v26 = vand.u32 4294901760, %v3039_v19  ;;  %v3071_v1 = vld [vmem:[#allocation5 + $0x138] sm:$0xff] }
  0x57   :  { %4549 = vst [vmem:[#allocation80_spill] sm:$0xff] %v3048_v44  ;;  %532 = vmatprep.subr.mxu1 %v531_v53  ;;  %259 = vmatprep.subr.mxu0 %v3037_v39  ;;  %4550 = vst [vmem:[#allocation81_spill] sm:$0xff] %v3056_v41  ;;  %v543_v60 = vand.u32 4294901760, %v542_v46  ;;  %v4552_v53 = vand.u32 4294901760, %v3023_v51  ;;  %v4554_v21 = vand.u32 4294901760, %v3034_v7  ;;  %v3080_v46 = vsub.f32 %v2927_v29, %v2957_v61 }
  0x58   :  { %4551 = vst [vmem:[#allocation82_spill] sm:$0xff] %v3060_v47  ;;  %538 = vmatpush2.msra.mxu1 %v537_v36  ;;  %4553 = vst [vmem:[#allocation83_spill] sm:$0xff] %v3069_v26  ;;  %v549_v28 = vand.u32 4294901760, %v548_v30  ;;  %261 = vmatpush2.msra.mxu0 %v3056_v41  ;;  %v4556_v43 = vand.u32 4294901760, %v3048_v44  ;;  %v3093_v36 = vsub.f32 %v2950_v50, %v2977_v27 }
  0x59   :  { %v554_v56 = vsub.f32 %v3023_v51, %v4552_v53  ;;  %v560_v37 = vsub.f32 %v3034_v7, %v4554_v21  ;;  %4555 = vst [vmem:[#allocation84_spill] sm:$0xff] %v3080_v46  ;;  %v3082_v53 = vld [vmem:[#allocation5 + $0x130] sm:$0xff]  ;;  %544 = vmatprep.subr.mxu1 %v543_v60  ;;  %263 = vmatprep.subr.mxu0 %v3069_v26  ;;  %v3089_v21 = vand.u32 4294901760, %v3062_v20  ;;  %v3095_v7 = vld [vmem:[#allocation5 + $0x128] sm:$0xff]  ;;  %v4559_v60 = vand.u32 4294901760, %v3060_v47 }
  0x5a   :  { %v566_v30 = vsub.f32 %v3048_v44, %v4556_v43  ;;  %4558 = vst [vmem:[#allocation86_spill] sm:$0xff] %v3093_v36  ;;  %550 = vmatpush2.msra.mxu1 %v549_v28  ;;  %v3102_v43 = vand.u32 4294901760, %v3071_v1  ;;  %v3104_v44 = vld [vmem:[#allocation5 + $0x120] sm:$0xff]  ;;  %v4341_v50 = vand.u32 4294901760, %v3093_v36  ;;  %v3110_v28 = vsub.f32 %v2959_v34, %v2990_v14 }
  0x5b   :  { %v555_v13 = vand.u32 4294901760, %v554_v56  ;;  %4557 = vst [vmem:[#allocation85_spill] sm:$0xff] %v3089_v21  ;;  %v561_v29 = vand.u32 4294901760, %v560_v37  ;;  %v572_v56 = vsub.f32 %v3060_v47, %v4559_v60  ;;  %265 = vmatpush2.msra.mxu0 %v3089_v21  ;;  %v3113_v37 = vand.u32 4294901760, %v3082_v53  ;;  %v3115_v60 = vld [vmem:[#allocation5 + $0x118] sm:$0xff] }
  0x5c   :  { %4560 = vst [vmem:[#allocation87_spill] sm:$0xff] %v3102_v43  ;;  %v567_v51 = vand.u32 4294901760, %v566_v30  ;;  %4561 = vst [vmem:[#allocation88_spill] sm:$0xff] %v3110_v28  ;;  %v4562_v27 = vand.u32 4294901760, %v3080_v46  ;;  %267 = vmatprep.subr.mxu0 %v3102_v43  ;;  %v3123_v30 = vsub.f32 %v2970_v62, %v3001_v49  ;;  %v3126_v34 = vand.u32 4294901760, %v3095_v7  ;;  %v3140_v62 = vld [vmem:[#allocation5 + $0x110] sm:$0xff] }
  0x5d   :  { %556 = vmatprep.subr.mxu1 %v555_v13  ;;  %v573_v61 = vand.u32 4294901760, %v572_v56  ;;  %v584_v14 = vsub.f32 %v3093_v36, %v4341_v50  ;;  %269 = vmatpush2.msra.mxu0 %v3113_v37  ;;  %v3138_v56 = vand.u32 4294901760, %v3104_v44  ;;  %v3146_v50 = vsub.f32 %v2992_v38, %v3026_v2 }
  0x5e   :  { %562 = vmatpush2.msra.mxu1 %v561_v29  ;;  %v578_v13 = vsub.f32 %v3080_v46, %v4562_v27  ;;  %4563 = vst [vmem:[#allocation89_spill] sm:$0xff] %v3123_v30  ;;  %4564 = vst [vmem:[#allocation90_spill] sm:$0xff] %v3126_v34  ;;  %v3135_v27 = vsub.f32 %v2983_v12, %v3014_v32  ;;  %271 = vmatprep.subr.mxu0 %v3126_v34  ;;  %v3149_v29 = vand.u32 4294901760, %v3115_v60  ;;  %v3151_v12 = vld [vmem:[#allocation5 + $0x108] sm:$0xff] }
  0x5f   :  { %568 = vmatprep.subr.mxu1 %v567_v51  ;;  %4565 = vst [vmem:[#allocation91_spill] sm:$0xff] %v3138_v56  ;;  %v4352_v51 = vand.u32 4294901760, %v3123_v30  ;;  %4566 = vst [vmem:[#allocation92_spill] sm:$0xff] %v3146_v50  ;;  %v585_v32 = vand.u32 4294901760, %v584_v14  ;;  %v4568_v36 = vand.u32 4294901760, %v3110_v28  ;;  %273 = vmatpush2.msra.mxu0 %v3138_v56  ;;  %v3168_v14 = vand.u32 4294901760, %v3140_v62 }
  0x60   :  { %574 = vmatpush2.msra.mxu1 %v573_v61  ;;  %v579_v49 = vand.u32 4294901760, %v578_v13  ;;  %4567 = vst [vmem:[#allocation93_spill] sm:$0xff] %v3149_v29  ;;  %v3160_v13 = vsub.f32 %v3003_v52, %v3037_v39  ;;  %275 = vmatprep.subr.mxu0 %v3149_v29  ;;  %v3174_v61 = vld [vmem:[#allocation5 + $0x100] sm:$0xff]  ;;  %v3181_v2 = vand.u32 4294901760, %v3151_v12  ;;  %v4572_v47 = vand.u32 4294901760, %v3146_v50 }
  0x61   :  { %v590_v46 = vsub.f32 %v3110_v28, %v4568_v36  ;;  %v596_v38 = vsub.f32 %v3123_v30, %v4352_v51  ;;  %4570 = vst [vmem:[#allocation95_spill] sm:$0xff] %v3168_v14  ;;  %v3172_v36 = vsub.f32 %v3028_v33, %v3056_v41  ;;  %v41_v30 = vld [vmem:[#allocation2] sm:$0x77]  ;;  %277 = vmatpush2.msra.mxu0 %v3168_v14 }
  0x62   :  { %4569 = vst [vmem:[#allocation94_spill] sm:$0xff] %v3160_v13  ;;  %580 = vmatprep.subr.mxu1 %v579_v49  ;;  %v4571_v49 = vand.u32 4294901760, %v3135_v27  ;;  %v4363_v51 = vand.u32 4294901760, %v3160_v13  ;;  %v608_v33 = vsub.f32 %v3146_v50, %v4572_v47  ;;  %279 = vmatprep.subr.mxu0 %v3181_v2  ;;  %v3201_v47 = vsub.f32 %v3062_v20, %v3089_v21 }
  0x63   :  { %586 = vmatpush2.msra.mxu1 %v585_v32  ;;  %v591_v52 = vand.u32 4294901760, %v590_v46  ;;  %v597_v28 = vand.u32 4294901760, %v596_v38  ;;  %v3190_v46 = vsub.f32 %v3039_v19, %v3069_v26  ;;  %v3197_v38 = vand.u32 4294901760, %v3174_v61 }
  0x64   :  { %v602_v39 = vsub.f32 %v3135_v27, %v4571_v49  ;;  %v614_v41 = vsub.f32 %v3160_v13, %v4363_v51  ;;  %v609_v32 = vand.u32 4294901760, %v608_v33  ;;  %v4573_v19 = vand.u32 4294901760, %v3172_v36 }
  0x65   :  { %592 = vmatprep.subr.mxu1 %v591_v52  ;;  %v152_v26 = vcombine.high %v41_v30, %v41_v30  ;;  %281 = vmatpush2.msra.mxu0 %v3197_v38  ;;  %v4370_v13 = vand.u32 4294901760, %v3201_v47  ;;  %v3209_v50 = vand.u32 4294901760, %v41_v30  ;;  %v3213_v20 = vsub.f32 %v3071_v1, %v3102_v43 }
  0x66   :  { %v603_v49 = vand.u32 4294901760, %v602_v39  ;;  %598 = vmatpush2.msra.mxu1 %v597_v28  ;;  %v620_v52 = vsub.f32 %v3172_v36, %v4573_v19  ;;  %v4368_v39 = vand.u32 4294901760, %v3190_v46  ;;  %v615_v51 = vand.u32 4294901760, %v614_v41  ;;  %694 = vmatprep.subr.mxu0 %v2439_v18 }
  0x67   :  { %4574 = vst [vmem:[#allocation96_spill] sm:$0xff] %v3209_v50  ;;  %v3218_v19 = vand.u32 4294901760, %v152_v26  ;;  %v3223_v41 = vsub.f32 %v3082_v53, %v3113_v37  ;;  %v632_v1 = vsub.f32 %v3201_v47, %v4370_v13 }
  0x68   :  { %604 = vmatprep.subr.mxu1 %v603_v49  ;;  %v621_v28 = vand.u32 4294901760, %v620_v52  ;;  %v626_v33 = vsub.f32 %v3190_v46, %v4368_v39  ;;  %v3230_v49 = vsub.f32 %v41_v30, %v3209_v50  ;;  %v3234_v52 = vsub.f32 %v3095_v7, %v3126_v34 }
  0x69   :  { %610 = vmatpush2.msra.mxu1 %v609_v32  ;;  %4575 = vst [vmem:[#allocation97_spill] sm:$0xff] %v3218_v19  ;;  %v4373_v32 = vand.u32 4294901760, %v3213_v20  ;;  %v3237_v18 = vsub.f32 %v152_v26, %v3218_v19  ;;  %v4374_v53 = vand.u32 4294901760, %v3223_v41  ;;  %684 = vmatprep.mubr.f32.mxu1 %v3218_v19  ;;  %v633_v13 = vand.u32 4294901760, %v632_v1 }
  0x6a   :  { %616 = vmatprep.subr.mxu1 %v615_v51  ;;  %v627_v39 = vand.u32 4294901760, %v626_v33  ;;  %v3242_v51 = vsub.f32 %v3104_v44, %v3138_v56  ;;  %v4377_v7 = vand.u32 4294901760, %v3230_v49  ;;  %v3257_v1 = vsub.f32 %v3115_v60, %v3149_v29 }
  0x6b   :  { %622 = vmatpush2.msra.mxu1 %v621_v28  ;;  %v638_v30 = vsub.f32 %v3213_v20, %v4373_v32  ;;  %v4380_v28 = vand.u32 4294901760, %v3234_v52  ;;  %v644_v33 = vsub.f32 %v3223_v41, %v4374_v53  ;;  %v3267_v26 = vsub.f32 %v3140_v62, %v3168_v14 }
  0x6c   :  { %628 = vmatprep.subr.mxu1 %v627_v39  ;;  %v291_v32 = vsub.f32 %v3230_v49, %v4377_v7  ;;  %v4577_v53 = vand.u32 4294901760, %v3237_v18  ;;  %v4388_v29 = vand.u32 4294901760, %v3257_v1  ;;  %v3279_v62 = vsub.f32 %v3151_v12, %v3181_v2 }
  0x6d   :  { %634 = vmatpush2.msra.mxu1 %v633_v13  ;;  %v639_v19 = vand.u32 4294901760, %v638_v30  ;;  %v650_v39 = vsub.f32 %v3234_v52, %v4380_v28  ;;  %4576 = vst [vmem:[#allocation98_spill] sm:$0xff] %v3267_v26  ;;  %v645_v60 = vand.u32 4294901760, %v644_v33  ;;  %v4578_v13 = vand.u32 4294901760, %v3242_v51 }
  0x6e   :  { %v285_v44 = vsub.f32 %v3237_v18, %v4577_v53  ;;  %v292_v7 = vand.u32 4294901760, %v291_v32  ;;  %v4387_v28 = vand.u32 4294901760, %v3267_v26  ;;  %v662_v53 = vsub.f32 %v3257_v1, %v4388_v29  ;;  %v4595_v29 = vld [vmem:[#allocation19_spill] sm:$0xff] }
  0x6f   :  { %v656_v30 = vsub.f32 %v3242_v51, %v4578_v13  ;;  %640 = vmatprep.subr.mxu1 %v639_v19  ;;  %v651_v56 = vand.u32 4294901760, %v650_v39  ;;  %v3286_v33 = vsub.f32 %v3174_v61, %v3197_v38  ;;  %v4386_v32 = vand.u32 4294901760, %v3279_v62  ;;  %v4582_v13 = vld [vmem:[#allocation30_spill] sm:$0xff] }
  0x70   :  { %v286_v14 = vand.u32 4294901760, %v285_v44  ;;  %646 = vmatpush2.msra.mxu1 %v645_v60  ;;  %v668_v19 = vsub.f32 %v3267_v26, %v4387_v28  ;;  %v663_v12 = vand.u32 4294901760, %v662_v53  ;;  %v4584_v53 = vld [vmem:[#allocation32_spill] sm:$0xff]  ;;  %v4594_v28 = vld [vmem:[#allocation42_spill] sm:$0xff] }
  0x71   :  { %v657_v34 = vand.u32 4294901760, %v656_v30  ;;  %4579 = vst [vmem:[#allocation99_spill] sm:$0xff] %v3286_v33  ;;  %652 = vmatprep.subr.mxu1 %v651_v56  ;;  %v4385_v44 = vand.u32 4294901760, %v3286_v33  ;;  %v674_v60 = vsub.f32 %v3279_v62, %v4386_v32  ;;  %v4583_v30 = vld [vmem:[#allocation13_spill] sm:$0xff]  ;;  %v4593_v32 = vld [vmem:[#allocation18_spill] sm:$0xff] }
  0x72   :  { %287 = vmatprep.mubr.f32.mxu0 %v286_v14  ;;  %v669_v39 = vand.u32 4294901760, %v668_v19  ;;  %v4580_v14 = vld [vmem:[#allocation28_spill] sm:$0xff]  ;;  %v4585_v19 = vld [vmem:[#allocation14_spill] sm:$0xff] }
  0x73   :  { %658 = vmatpush2.msra.mxu1 %v657_v34  ;;  %293 = vmatmul.mubr.f32.vlgmr.msra.gmra.mxu0 %v292_v7  ;;  %v680_v56 = vsub.f32 %v3286_v33, %v4385_v44  ;;  %v675_v34 = vand.u32 4294901760, %v674_v60  ;;  %v4581_v7 = vld [vmem:[#allocation12_spill] sm:$0xff] }
  0x74   :  { %697 = vmatpush1.msra.mxu0 %v2452_v23  ;;  %664 = vmatprep.subr.mxu1 %v663_v12  ;;  %v4586_v12 = vld [vmem:[#allocation34_spill] sm:$0xff]  ;;  %v4588_v60 = vld [vmem:[#allocation36_spill] sm:$0xff] }
  0x75   :  { %700 = vmatprep.subr.mxu0 %v2458_v25  ;;  %670 = vmatpush2.msra.mxu1 %v669_v39  ;;  %v681_v61 = vand.u32 4294901760, %v680_v56  ;;  %v4587_v39 = vld [vmem:[#allocation15_spill] sm:$0xff]  ;;  %v4589_v56 = vld [vmem:[#allocation16_spill] sm:$0xff] }
  0x76   :  { %703 = vmatpush1.msra.mxu0 %v2472_v31  ;;  %886 = vmatprep.mubr.f32.mxu0 %v3237_v18  ;;  %v4592_v44 = vld [vmem:[#allocation40_spill] sm:$0xff] }
  0x77   :  { %706 = vmatprep.subr.mxu0 %v2481_v35  ;;  %676 = vmatprep.subr.mxu1 %v675_v34  ;;  %v4590_v34 = vld [vmem:[#allocation38_spill] sm:$0xff] }
  0x78   :  { %709 = vmatpush1.msra.mxu0 %v2494_v40  ;;  %682 = vmatpush2.msra.mxu1 %v681_v61  ;;  %v4591_v61 = vld [vmem:[#allocation17_spill] sm:$0xff] }
  0x79   :  { %712 = vmatprep.subr.mxu0 %v2508_v45  ;;  %686 = vmatmul.mubr.f32.vlgmr.msra.gmra.mxu1 %v3209_v50  ;;  %v4596_v50 = vld [vmem:[#allocation44_spill] sm:$0xff] }
  0x7a   :  { %715 = vmatpush1.msra.mxu0 %v2534_v59  ;;  %896 = vmatprep.subr.mxu1 %v2419_v3 }
  0x7b   :  { %718 = vmatprep.subr.mxu0 %v2546_v0  ;;  %898 = vmatpush1.msra.mxu1 %v2421_v4 }
  0x7c   :  { %721 = vmatpush1.msra.mxu0 %v2557_v8  ;;  %900 = vmatprep.subr.mxu1 %v2423_v5 }
  0x7d   :  { %724 = vmatprep.subr.mxu0 %v2568_v42  ;;  %902 = vmatpush1.msra.mxu1 %v2425_v9 }
  0x7e   :  { %727 = vmatpush1.msra.mxu0 %v2580_v48  ;;  %904 = vmatprep.subr.mxu1 %v2427_v10 }
  0x7f   :  { %730 = vmatprep.subr.mxu0 %v2594_v57  ;;  %906 = vmatpush1.msra.mxu1 %v2429_v11 }
  0x80   :  { %733 = vmatpush1.msra.mxu0 %v2606_v6  ;;  %908 = vmatprep.subr.mxu1 %v2432_v15 }
  0x81   :  { %736 = vmatprep.subr.mxu0 %v2627_v54  ;;  %910 = vmatpush1.msra.mxu1 %v2434_v16 }
  0x82   :  { %739 = vmatpush1.msra.mxu0 %v2640_v63  ;;  %912 = vmatprep.subr.mxu1 %v2436_v17 }
  0x83   :  { %742 = vmatprep.subr.mxu0 %v2658_v55  ;;  %914 = vmatpush1.msra.mxu1 %v2449_v22 }
  0x84   :  { %745 = vmatpush1.msra.mxu0 %v2671_v58  ;;  %916 = vmatprep.subr.mxu1 %v2455_v24 }
  0x85   :  { %748 = vmatprep.subr.mxu0 %v4580_v14  ;;  %918 = vmatpush1.msra.mxu1 %v4581_v7 }
  0x86   :  { %751 = vmatpush1.msra.mxu0 %v4582_v13  ;;  %920 = vmatprep.subr.mxu1 %v4583_v30 }
  0x87   :  { %754 = vmatprep.subr.mxu0 %v4584_v53  ;;  %922 = vmatpush1.msra.mxu1 %v4585_v19  ;;  %v4597_v19 = vld [vmem:[#allocation20_spill] sm:$0xff] }
  0x88   :  { %757 = vmatpush1.msra.mxu0 %v4586_v12  ;;  %924 = vmatprep.subr.mxu1 %v4587_v39  ;;  %v4598_v39 = vld [vmem:[#allocation46_spill] sm:$0xff] }
  0x89   :  { %760 = vmatprep.subr.mxu0 %v4588_v60  ;;  %926 = vmatpush1.msra.mxu1 %v4589_v56  ;;  %v4599_v60 = vld [vmem:[#allocation21_spill] sm:$0xff]  ;;  %v4600_v56 = vld [vmem:[#allocation48_spill] sm:$0xff] }
  0x8a   :  { %763 = vmatpush1.msra.mxu0 %v4590_v34  ;;  %928 = vmatprep.subr.mxu1 %v4591_v61  ;;  %v4601_v34 = vld [vmem:[#allocation22_spill] sm:$0xff] }
  0x8b   :  { %766 = vmatprep.subr.mxu0 %v4592_v44  ;;  %930 = vmatpush1.msra.mxu1 %v4593_v32  ;;  %v4602_v61 = vld [vmem:[#allocation50_spill] sm:$0xff]  ;;  %v4603_v44 = vld [vmem:[#allocation23_spill] sm:$0xff]  ;;  %v4604_v32 = vld [vmem:[#allocation52_spill] sm:$0xff] }
  0x8c   :  { %769 = vmatpush1.msra.mxu0 %v4594_v28  ;;  %932 = vmatprep.subr.mxu1 %v4595_v29  ;;  %v4605_v28 = vld [vmem:[#allocation24_spill] sm:$0xff]  ;;  %v4606_v29 = vld [vmem:[#allocation54_spill] sm:$0xff] }
  0x8d   :  { %772 = vmatprep.subr.mxu0 %v4596_v50  ;;  %934 = vmatpush1.msra.mxu1 %v4597_v19  ;;  %v4607_v50 = vld [vmem:[#allocation25_spill] sm:$0xff]  ;;  %v4608_v19 = vld [vmem:[#allocation56_spill] sm:$0xff] }
  0x8e   :  { %775 = vmatpush1.msra.mxu0 %v4598_v39  ;;  %936 = vmatprep.subr.mxu1 %v4599_v60  ;;  %v4609_v39 = vld [vmem:[#allocation26_spill] sm:$0xff] }
  0x8f   :  { %778 = vmatprep.subr.mxu0 %v4600_v56  ;;  %938 = vmatpush1.msra.mxu1 %v4601_v34  ;;  %v4610_v60 = vld [vmem:[#allocation58_spill] sm:$0xff]  ;;  %v4611_v56 = vld [vmem:[#allocation27_spill] sm:$0xff]  ;;  %v4612_v34 = vld [vmem:[#allocation60_spill] sm:$0xff] }
  0x90   :  { %781 = vmatpush1.msra.mxu0 %v4602_v61  ;;  %940 = vmatprep.subr.mxu1 %v4603_v44  ;;  %v4613_v61 = vld [vmem:[#allocation29_spill] sm:$0xff]  ;;  %v4614_v44 = vld [vmem:[#allocation62_spill] sm:$0xff] }
  0x91   :  { %784 = vmatprep.subr.mxu0 %v4604_v32  ;;  %942 = vmatpush1.msra.mxu1 %v4605_v28  ;;  %v4615_v32 = vld [vmem:[#allocation31_spill] sm:$0xff]  ;;  %v4616_v28 = vld [vmem:[#allocation64_spill] sm:$0xff] }
  0x92   :  { %787 = vmatpush1.msra.mxu0 %v4606_v29  ;;  %944 = vmatprep.subr.mxu1 %v4607_v50  ;;  %v4617_v29 = vld [vmem:[#allocation33_spill] sm:$0xff]  ;;  %v4618_v50 = vld [vmem:[#allocation66_spill] sm:$0xff] }
  0x93   :  { %790 = vmatprep.subr.mxu0 %v4608_v19  ;;  %946 = vmatpush1.msra.mxu1 %v4609_v39  ;;  %v4619_v19 = vld [vmem:[#allocation35_spill] sm:$0xff]  ;;  %v4620_v39 = vld [vmem:[#allocation68_spill] sm:$0xff] }
  0x94   :  { %793 = vmatpush2.msra.mxu0 %v4610_v60  ;;  %948 = vmatprep.subr.mxu1 %v4611_v56  ;;  %v4621_v60 = vld [vmem:[#allocation37_spill] sm:$0xff]  ;;  %v4622_v56 = vld [vmem:[#allocation70_spill] sm:$0xff] }
  0x95   :  { %796 = vmatprep.subr.mxu0 %v4612_v34  ;;  %950 = vmatpush1.msra.mxu1 %v4613_v61  ;;  %v4623_v34 = vld [vmem:[#allocation39_spill] sm:$0xff]  ;;  %v4624_v61 = vld [vmem:[#allocation72_spill] sm:$0xff] }
  0x96   :  { %799 = vmatpush2.msra.mxu0 %v4614_v44  ;;  %952 = vmatprep.subr.mxu1 %v4615_v32  ;;  %v4625_v44 = vld [vmem:[#allocation41_spill] sm:$0xff]  ;;  %v4626_v32 = vld [vmem:[#allocation74_spill] sm:$0xff] }
  0x97   :  { %802 = vmatprep.subr.mxu0 %v4616_v28  ;;  %954 = vmatpush1.msra.mxu1 %v4617_v29  ;;  %v4627_v28 = vld [vmem:[#allocation43_spill] sm:$0xff]  ;;  %v4628_v29 = vld [vmem:[#allocation76_spill] sm:$0xff] }
  0x98   :  { %805 = vmatpush2.msra.mxu0 %v4618_v50  ;;  %956 = vmatprep.subr.mxu1 %v4619_v19  ;;  %v4629_v50 = vld [vmem:[#allocation45_spill] sm:$0xff]  ;;  %v4630_v19 = vld [vmem:[#allocation78_spill] sm:$0xff] }
  0x99   :  { %808 = vmatprep.subr.mxu0 %v4620_v39  ;;  %958 = vmatpush1.msra.mxu1 %v4621_v60  ;;  %v4631_v39 = vld [vmem:[#allocation47_spill] sm:$0xff]  ;;  %v4632_v60 = vld [vmem:[#allocation80_spill] sm:$0xff] }
  0x9a   :  { %811 = vmatpush2.msra.mxu0 %v4622_v56  ;;  %960 = vmatprep.subr.mxu1 %v4623_v34  ;;  %v4633_v56 = vld [vmem:[#allocation49_spill] sm:$0xff]  ;;  %v4634_v34 = vld [vmem:[#allocation82_spill] sm:$0xff] }
  0x9b   :  { %814 = vmatprep.subr.mxu0 %v4624_v61  ;;  %962 = vmatpush2.msra.mxu1 %v4625_v44  ;;  %v4635_v61 = vld [vmem:[#allocation51_spill] sm:$0xff]  ;;  %v4636_v44 = vld [vmem:[#allocation84_spill] sm:$0xff] }
  0x9c   :  { %817 = vmatpush2.msra.mxu0 %v4626_v32  ;;  %964 = vmatprep.subr.mxu1 %v4627_v28  ;;  %v4637_v32 = vld [vmem:[#allocation53_spill] sm:$0xff]  ;;  %v4638_v28 = vld [vmem:[#allocation86_spill] sm:$0xff] }
  0x9d   :  { %820 = vmatprep.subr.mxu0 %v4628_v29  ;;  %966 = vmatpush2.msra.mxu1 %v4629_v50  ;;  %v4639_v29 = vld [vmem:[#allocation55_spill] sm:$0xff]  ;;  %v4640_v50 = vld [vmem:[#allocation88_spill] sm:$0xff] }
  0x9e   :  { %823 = vmatpush2.msra.mxu0 %v4630_v19  ;;  %968 = vmatprep.subr.mxu1 %v4631_v39  ;;  %v4641_v19 = vld [vmem:[#allocation57_spill] sm:$0xff] }
  0x9f   :  { %826 = vmatprep.subr.mxu0 %v4632_v60  ;;  %970 = vmatpush2.msra.mxu1 %v4633_v56  ;;  %v4642_v39 = vld [vmem:[#allocation89_spill] sm:$0xff]  ;;  %v4643_v60 = vld [vmem:[#allocation59_spill] sm:$0xff] }
  0xa0   :  { %829 = vmatpush2.msra.mxu0 %v4634_v34  ;;  %972 = vmatprep.subr.mxu1 %v4635_v61  ;;  %v4644_v56 = vld [vmem:[#allocation61_spill] sm:$0xff]  ;;  %v4645_v61 = vld [vmem:[#allocation92_spill] sm:$0xff] }
  0xa1   :  { %832 = vmatprep.subr.mxu0 %v4636_v44  ;;  %974 = vmatpush2.msra.mxu1 %v4637_v32  ;;  %v4646_v44 = vld [vmem:[#allocation63_spill] sm:$0xff]  ;;  %v4647_v32 = vld [vmem:[#allocation94_spill] sm:$0xff] }
  0xa2   :  { %835 = vmatpush2.msra.mxu0 %v4638_v28  ;;  %976 = vmatprep.subr.mxu1 %v4639_v29  ;;  %v4648_v28 = vld [vmem:[#allocation65_spill] sm:$0xff]  ;;  %v4649_v29 = vld [vmem:[#allocation67_spill] sm:$0xff] }
  0xa3   :  { %838 = vmatprep.subr.mxu0 %v4640_v50  ;;  %978 = vmatpush2.msra.mxu1 %v4641_v19  ;;  %v4650_v19 = vld [vmem:[#allocation69_spill] sm:$0xff] }
  0xa4   :  { %841 = vmatpush2.msra.mxu0 %v4642_v39  ;;  %980 = vmatprep.subr.mxu1 %v4643_v60  ;;  %v4651_v60 = vld [vmem:[#allocation71_spill] sm:$0xff] }
  0xa5   :  { %844 = vmatprep.subr.mxu0 %v3135_v27  ;;  %982 = vmatpush2.msra.mxu1 %v4644_v56  ;;  %v4652_v56 = vld [vmem:[#allocation73_spill] sm:$0xff] }
  0xa6   :  { %847 = vmatpush2.msra.mxu0 %v4645_v61  ;;  %984 = vmatprep.subr.mxu1 %v4646_v44  ;;  %v4653_v44 = vld [vmem:[#allocation75_spill] sm:$0xff] }
  0xa7   :  { %850 = vmatprep.subr.mxu0 %v4647_v32  ;;  %986 = vmatpush2.msra.mxu1 %v4648_v28  ;;  %v4654_v28 = vld [vmem:[#allocation77_spill] sm:$0xff] }
  0xa8   :  { %853 = vmatpush2.msra.mxu0 %v3172_v36  ;;  %988 = vmatprep.subr.mxu1 %v4649_v29  ;;  %v4655_v29 = vld [vmem:[#allocation79_spill] sm:$0xff] }
  0xa9   :  { %856 = vmatprep.subr.mxu0 %v3190_v46  ;;  %990 = vmatpush2.msra.mxu1 %v4650_v19  ;;  %v4656_v19 = vld [vmem:[#allocation81_spill] sm:$0xff] }
  0xaa   :  { %859 = vmatpush2.msra.mxu0 %v3201_v47  ;;  %992 = vmatprep.subr.mxu1 %v4651_v60  ;;  %v4657_v60 = vld [vmem:[#allocation83_spill] sm:$0xff] }
  0xab   :  { %862 = vmatprep.subr.mxu0 %v3213_v20  ;;  %994 = vmatpush2.msra.mxu1 %v4652_v56 }
  0xac   :  { %865 = vmatpush2.msra.mxu0 %v3223_v41  ;;  %996 = vmatprep.subr.mxu1 %v4653_v44 }
  0xad   :  { %868 = vmatprep.subr.mxu0 %v3234_v52  ;;  %998 = vmatpush2.msra.mxu1 %v4654_v28  ;;  %v4658_v28 = vld [vmem:[#allocation11_spill] sm:$0xff] }
  0xae   :  { %871 = vmatpush2.msra.mxu0 %v3242_v51  ;;  %1000 = vmatprep.subr.mxu1 %v4655_v29  ;;  %v4659_v29 = vand.u32 4294901760, %v4658_v28  ;;  %v4666_v28 = vand.u32 4294901760, %v2481_v35  ;;  %v4672_v35 = vand.u32 4294901760, %v3230_v49 }
  0xaf   :  { %874 = vmatprep.subr.mxu0 %v3257_v1  ;;  %1002 = vmatpush2.msra.mxu1 %v4656_v19  ;;  %v4660_v19 = vand.u32 4294901760, %v2452_v23  ;;  %v4668_v23 = vand.u32 4294901760, %v2494_v40  ;;  %v4674_v40 = vand.u32 4294901760, %v2557_v8 }
  0xb0   :  { %877 = vmatpush2.msra.mxu0 %v3267_v26  ;;  %1004 = vmatprep.subr.mxu1 %v4657_v60  ;;  %v4661_v26 = vld [vmem:[#allocation90_spill] sm:$0xff]  ;;  %v4662_v60 = vand.u32 4294901760, %v2458_v25  ;;  %v4669_v25 = vand.u32 4294901760, %v2508_v45  ;;  %v4675_v45 = vand.u32 4294901760, %v2568_v42  ;;  %v4690_v42 = vld [vmem:[#allocation15_spill] sm:$0xff] }
  0xb1   :  { %880 = vmatprep.subr.mxu0 %v3279_v62  ;;  %1006 = vmatpush2.msra.mxu1 %v3089_v21  ;;  %v4663_v21 = vld [vmem:[#allocation91_spill] sm:$0xff] }
  0xb2   :  { %883 = vmatpush2.msra.mxu0 %v3286_v33  ;;  %1008 = vmatprep.subr.mxu1 %v3102_v43  ;;  %v4664_v33 = vand.u32 4294901760, %v2472_v31  ;;  %v4665_v43 = vld [vmem:[#allocation93_spill] sm:$0xff]  ;;  %v4670_v31 = vand.u32 4294901760, %v3237_v18  ;;  %v4676_v18 = vand.u32 4294901760, %v2580_v48 }
  0xb3   :  { %889 = vmatmul.mubr.f32.vlgmr.msra.gmra.mxu0 %v3230_v49  ;;  %1039 = vmatprep.subr.mxu0 %v4659_v29  ;;  %v4667_v29 = vld [vmem:[#allocation95_spill] sm:$0xff]  ;;  %v4699_v49 = vld [vmem:[#allocation18_spill] sm:$0xff] }
  0xb4   :  { %1010 = vmatpush2.msra.mxu1 %v3113_v37  ;;  %1043 = vmatpush1.msra.mxu0 %v4660_v19  ;;  %v4673_v19 = vand.u32 4294901760, %v2546_v0  ;;  %v4687_v0 = vld [vmem:[#allocation14_spill] sm:$0xff] }
  0xb5   :  { %1012 = vmatprep.subr.mxu1 %v4661_v26  ;;  %1047 = vmatprep.subr.mxu0 %v4662_v60  ;;  %v4706_v60 = vld [vmem:[#allocation48_spill] sm:$0xff] }
  0xb6   :  { %1014 = vmatpush2.msra.mxu1 %v4663_v21  ;;  %1051 = vmatpush1.msra.mxu0 %v4664_v33  ;;  %v4671_v33 = vand.u32 4294901760, %v2534_v59  ;;  %v4677_v59 = vand.u32 4294901760, %v2594_v57  ;;  %v4694_v57 = vld [vmem:[#allocation40_spill] sm:$0xff] }
  0xb7   :  { %1016 = vmatprep.subr.mxu1 %v4665_v43  ;;  %1055 = vmatprep.subr.mxu0 %v4666_v28  ;;  %v4707_v28 = vand.u32 4294901760, %v4706_v60 }
  0xb8   :  { %1018 = vmatpush2.msra.mxu1 %v4667_v29  ;;  %1059 = vmatpush1.msra.mxu0 %v4668_v23  ;;  %v4708_v23 = vld [vmem:[#allocation21_spill] sm:$0xff] }
  0xb9   :  { %1020 = vmatprep.subr.mxu1 %v3181_v2  ;;  %1063 = vmatprep.subr.mxu0 %v4669_v25  ;;  %v4709_v25 = vld [vmem:[#allocation50_spill] sm:$0xff] }
  0xba   :  { %1022 = vmatpush2.msra.mxu1 %v3197_v38  ;;  %1026 = vmatprep.mubr.f32.mxu1 %v4670_v31  ;;  %v4710_v31 = vand.u32 4294901760, %v4709_v25 }
  0xbb   :  { %1067 = vmatpush1.msra.mxu0 %v4671_v33  ;;  %1030 = vmatmul.mubr.f32.vlgmr.msra.gmra.mxu1 %v4672_v35  ;;  %v4711_v33 = vld [vmem:[#allocation22_spill] sm:$0xff]  ;;  %v4712_v35 = vld [vmem:[#allocation52_spill] sm:$0xff] }
  0xbc   :  { %1071 = vmatprep.subr.mxu0 %v4673_v19  ;;  %1302 = vmatprep.subr.mxu1 %v2419_v3  ;;  %v4678_v3 = vand.u32 4294901760, %v2606_v6  ;;  %v4696_v6 = vld [vmem:[#allocation17_spill] sm:$0xff]  ;;  %v4713_v19 = vand.u32 4294901760, %v4712_v35 }
  0xbd   :  { %1075 = vmatpush1.msra.mxu0 %v4674_v40  ;;  %1304 = vmatpush1.msra.mxu1 %v2421_v4  ;;  %v4679_v4 = vand.u32 4294901760, %v2627_v54  ;;  %v4693_v54 = vld [vmem:[#allocation16_spill] sm:$0xff]  ;;  %v4714_v40 = vld [vmem:[#allocation23_spill] sm:$0xff] }
  0xbe   :  { %1079 = vmatprep.subr.mxu0 %v4675_v45  ;;  %1306 = vmatprep.subr.mxu1 %v2423_v5  ;;  %v4680_v5 = vand.u32 4294901760, %v2640_v63  ;;  %v4695_v63 = vand.u32 4294901760, %v4694_v57  ;;  %v4715_v45 = vld [vmem:[#allocation54_spill] sm:$0xff] }
  0xbf   :  { %1083 = vmatpush1.msra.mxu0 %v4676_v18  ;;  %1308 = vmatpush1.msra.mxu1 %v2425_v9  ;;  %v4681_v9 = vand.u32 4294901760, %v2658_v55  ;;  %v4697_v55 = vld [vmem:[#allocation42_spill] sm:$0xff]  ;;  %v4716_v18 = vand.u32 4294901760, %v4715_v45 }
  0xc0   :  { %1087 = vmatprep.subr.mxu0 %v4677_v59  ;;  %1310 = vmatprep.subr.mxu1 %v2427_v10  ;;  %v4682_v10 = vand.u32 4294901760, %v2671_v58  ;;  %v4698_v58 = vand.u32 4294901760, %v4697_v55  ;;  %v4717_v59 = vld [vmem:[#allocation24_spill] sm:$0xff] }
  0xc1   :  { %1091 = vmatpush1.msra.mxu0 %v4678_v3  ;;  %1312 = vmatpush1.msra.mxu1 %v2429_v11  ;;  %v4683_v11 = vand.u32 4294901760, %v4580_v14  ;;  %v4700_v14 = vld [vmem:[#allocation44_spill] sm:$0xff] }
  0xc2   :  { %1095 = vmatprep.subr.mxu0 %v4679_v4  ;;  %1314 = vmatprep.subr.mxu1 %v2432_v15  ;;  %v4684_v15 = vand.u32 4294901760, %v4582_v13  ;;  %v4702_v13 = vld [vmem:[#allocation19_spill] sm:$0xff]  ;;  %v4718_v3 = vld [vmem:[#allocation56_spill] sm:$0xff] }
  0xc3   :  { %1099 = vmatpush1.msra.mxu0 %v4680_v5  ;;  %1316 = vmatpush1.msra.mxu1 %v2434_v16  ;;  %v4685_v16 = vand.u32 4294901760, %v4584_v53  ;;  %v4719_v4 = vand.u32 4294901760, %v4718_v3  ;;  %v4720_v5 = vld [vmem:[#allocation25_spill] sm:$0xff] }
  0xc4   :  { %1103 = vmatprep.subr.mxu0 %v4681_v9  ;;  %1318 = vmatprep.subr.mxu1 %v2436_v17  ;;  %v4686_v17 = vand.u32 4294901760, %v4586_v12  ;;  %v4705_v12 = vld [vmem:[#allocation20_spill] sm:$0xff]  ;;  %v4721_v9 = vld [vmem:[#allocation58_spill] sm:$0xff]  ;;  %v4758_v3 = vld [vmem:[#allocation49_spill] sm:$0xff] }
  0xc5   :  { %1107 = vmatpush1.msra.mxu0 %v4682_v10  ;;  %1320 = vmatpush1.msra.mxu1 %v2449_v22  ;;  %v4688_v22 = vld [vmem:[#allocation36_spill] sm:$0xff]  ;;  %v4722_v10 = vand.u32 4294901760, %v4721_v9  ;;  %v4761_v9 = vld [vmem:[#allocation51_spill] sm:$0xff] }
  0xc6   :  { %1111 = vmatprep.subr.mxu0 %v4683_v11  ;;  %1322 = vmatprep.subr.mxu1 %v2455_v24  ;;  %v4689_v8 = vand.u32 4294901760, %v4688_v22  ;;  %v4691_v24 = vld [vmem:[#allocation38_spill] sm:$0xff] }
  0xc7   :  { %1115 = vmatpush1.msra.mxu0 %v4684_v15  ;;  %1324 = vmatpush1.msra.mxu1 %v4581_v7  ;;  %v4692_v48 = vand.u32 4294901760, %v4691_v24  ;;  %v4701_v7 = vand.u32 4294901760, %v4700_v14  ;;  %v4723_v11 = vld [vmem:[#allocation26_spill] sm:$0xff]  ;;  %v4724_v15 = vld [vmem:[#allocation60_spill] sm:$0xff] }
  0xc8   :  { %1119 = vmatprep.subr.mxu0 %v4685_v16  ;;  %1326 = vmatprep.subr.mxu1 %v4583_v30  ;;  %v4703_v30 = vld [vmem:[#allocation46_spill] sm:$0xff]  ;;  %v4725_v16 = vand.u32 4294901760, %v4724_v15  ;;  %v4764_v15 = vld [vmem:[#allocation53_spill] sm:$0xff] }
  0xc9   :  { %1123 = vmatpush1.msra.mxu0 %v4686_v17  ;;  %1328 = vmatpush1.msra.mxu1 %v4687_v0  ;;  %v4704_v53 = vand.u32 4294901760, %v4703_v30  ;;  %v4726_v17 = vld [vmem:[#allocation27_spill] sm:$0xff]  ;;  %v4727_v0 = vld [vmem:[#allocation62_spill] sm:$0xff] }
  0xca   :  { %1127 = vmatprep.subr.mxu0 %v4689_v8  ;;  %1330 = vmatprep.subr.mxu1 %v4690_v42  ;;  %v4728_v22 = vand.u32 4294901760, %v4727_v0  ;;  %v4729_v8 = vld [vmem:[#allocation29_spill] sm:$0xff]  ;;  %v4730_v42 = vld [vmem:[#allocation64_spill] sm:$0xff]  ;;  %v4765_v0 = vand.u32 4294901760, %v4640_v50 }
  0xcb   :  { %1131 = vmatpush1.msra.mxu0 %v4692_v48  ;;  %1332 = vmatpush1.msra.mxu1 %v4693_v54  ;;  %v4731_v24 = vand.u32 4294901760, %v4730_v42  ;;  %v4732_v48 = vld [vmem:[#allocation31_spill] sm:$0xff]  ;;  %v4733_v54 = vld [vmem:[#allocation66_spill] sm:$0xff]  ;;  %v4768_v42 = vld [vmem:[#allocation57_spill] sm:$0xff] }
  0xcc   :  { %1135 = vmatprep.subr.mxu0 %v4695_v63  ;;  %1334 = vmatprep.subr.mxu1 %v4696_v6  ;;  %v4734_v57 = vand.u32 4294901760, %v4733_v54  ;;  %v4735_v63 = vld [vmem:[#allocation33_spill] sm:$0xff]  ;;  %v4736_v6 = vld [vmem:[#allocation68_spill] sm:$0xff]  ;;  %v4770_v54 = vld [vmem:[#allocation59_spill] sm:$0xff] }
  0xcd   :  { %1139 = vmatpush1.msra.mxu0 %v4698_v58  ;;  %1336 = vmatpush1.msra.mxu1 %v4699_v49  ;;  %v4737_v55 = vand.u32 4294901760, %v4736_v6  ;;  %v4738_v58 = vld [vmem:[#allocation35_spill] sm:$0xff]  ;;  %v4739_v49 = vld [vmem:[#allocation70_spill] sm:$0xff]  ;;  %v134_v50 = vld [vmem:[#allocation5 + $0x2d8] sm:$0xff]  ;;  %v4771_v6 = vand.u32 4294901760, %v4645_v61 }
  0xce   :  { %1143 = vmatprep.subr.mxu0 %v4701_v7  ;;  %1338 = vmatprep.subr.mxu1 %v4702_v13  ;;  %v4740_v14 = vand.u32 4294901760, %v4739_v49  ;;  %v4741_v7 = vld [vmem:[#allocation37_spill] sm:$0xff]  ;;  %v4742_v13 = vld [vmem:[#allocation72_spill] sm:$0xff]  ;;  %v4773_v49 = vand.u32 4294901760, %v4647_v32  ;;  %v132_v61 = vld [vmem:[#allocation5 + $0x2c8] sm:$0xff] }
  0xcf   :  { %1147 = vmatpush1.msra.mxu0 %v4704_v53  ;;  %1340 = vmatpush1.msra.mxu1 %v4705_v12  ;;  %v4743_v30 = vand.u32 4294901760, %v4742_v13  ;;  %v4744_v53 = vld [vmem:[#allocation39_spill] sm:$0xff]  ;;  %v4745_v12 = vld [vmem:[#allocation74_spill] sm:$0xff]  ;;  %v4776_v13 = vld [vmem:[#allocation65_spill] sm:$0xff] }
  0xd0   :  { %1151 = vmatprep.subr.mxu0 %v4707_v28  ;;  %1342 = vmatprep.subr.mxu1 %v4708_v23  ;;  %v4746_v60 = vand.u32 4294901760, %v4745_v12  ;;  %v4747_v28 = vld [vmem:[#allocation41_spill] sm:$0xff]  ;;  %v4748_v23 = vld [vmem:[#allocation76_spill] sm:$0xff]  ;;  %v4777_v12 = vand.u32 4294901760, %v3190_v46  ;;  %v4782_v46 = vand.u32 4294901760, %v3213_v20 }
  0xd1   :  { %1155 = vmatpush1.msra.mxu0 %v4710_v31  ;;  %1344 = vmatpush1.msra.mxu1 %v4711_v33  ;;  %v4749_v25 = vand.u32 4294901760, %v4748_v23  ;;  %v4750_v31 = vld [vmem:[#allocation43_spill] sm:$0xff]  ;;  %v4751_v33 = vld [vmem:[#allocation78_spill] sm:$0xff]  ;;  %v130_v23 = vld [vmem:[#allocation5 + $0x2b8] sm:$0xff] }
  0xd2   :  { %1159 = vmatprep.subr.mxu0 %v4713_v19  ;;  %1346 = vmatprep.subr.mxu1 %v4714_v40  ;;  %v4752_v35 = vand.u32 4294901760, %v4751_v33  ;;  %v4753_v19 = vld [vmem:[#allocation45_spill] sm:$0xff]  ;;  %v4754_v40 = vld [vmem:[#allocation80_spill] sm:$0xff] }
  0xd3   :  { %1163 = vmatpush1.msra.mxu0 %v4716_v18  ;;  %1348 = vmatpush1.msra.mxu1 %v4717_v59  ;;  %v4755_v45 = vand.u32 4294901760, %v4754_v40  ;;  %v4756_v18 = vld [vmem:[#allocation47_spill] sm:$0xff]  ;;  %v4757_v59 = vand.u32 4294901760, %v4634_v34  ;;  %v3620_v40 = vand.u32 4294901760, %v132_v61 }
  0xd4   :  { %1167 = vmatprep.subr.mxu0 %v4719_v4  ;;  %1350 = vmatprep.subr.mxu1 %v4720_v5  ;;  %v4759_v4 = vld [vmem:[#allocation84_spill] sm:$0xff]  ;;  %v136_v34 = vld [vmem:[#allocation5 + $0x2e8] sm:$0xff] }
  0xd5   :  { %1171 = vmatpush2.msra.mxu0 %v4722_v10  ;;  %1352 = vmatpush1.msra.mxu1 %v4723_v11  ;;  %v4760_v5 = vand.u32 4294901760, %v4759_v4  ;;  %v4762_v10 = vld [vmem:[#allocation86_spill] sm:$0xff]  ;;  %4784 = vst [vmem:[#allocation12_spill] sm:$0xff] %v3620_v40  ;;  %v4788_v4 = vand.u32 4294901760, %v3234_v52 }
  0xd6   :  { %1175 = vmatprep.subr.mxu0 %v4725_v16  ;;  %1354 = vmatprep.subr.mxu1 %v4726_v17  ;;  %v4763_v11 = vand.u32 4294901760, %v4762_v10  ;;  %v138_v16 = vld [vmem:[#allocation5 + $0x2f8] sm:$0xff]  ;;  %v137_v17 = vld [vmem:[#allocation5 + $0x2f0] sm:$0xff]  ;;  %v128_v10 = vld [vmem:[#allocation5 + $0x2a8] sm:$0xff] }
  0xd7   :  { %1179 = vmatpush2.msra.mxu0 %v4728_v22  ;;  %1356 = vmatpush1.msra.mxu1 %v4729_v8  ;;  %v4766_v22 = vld [vmem:[#allocation55_spill] sm:$0xff]  ;;  %v4767_v8 = vand.u32 4294901760, %v4642_v39  ;;  %v3585_v39 = vand.u32 4294901760, %v136_v34 }
  0xd8   :  { %1183 = vmatprep.subr.mxu0 %v4731_v24  ;;  %1358 = vmatprep.subr.mxu1 %v4732_v48  ;;  %v135_v24 = vld [vmem:[#allocation5 + $0x2e0] sm:$0xff]  ;;  %v4769_v48 = vand.u32 4294901760, %v3135_v27  ;;  %v4774_v27 = vld [vmem:[#allocation63_spill] sm:$0xff] }
  0xd9   :  { %1187 = vmatpush2.msra.mxu0 %v4734_v57  ;;  %1360 = vmatpush1.msra.mxu1 %v4735_v63  ;;  %v3578_v57 = vand.u32 4294901760, %v138_v16  ;;  %v3580_v63 = vand.u32 4294901760, %v137_v17  ;;  %v3612_v33 = vsub.f32 %v136_v34, %v3585_v39  ;;  %v125_v34 = vld [vmem:[#allocation5 + $0x290] sm:$0xff] }
  0xda   :  { %1191 = vmatprep.subr.mxu0 %v4737_v55  ;;  %1362 = vmatprep.subr.mxu1 %v4738_v58  ;;  %v4772_v55 = vld [vmem:[#allocation61_spill] sm:$0xff]  ;;  %v133_v58 = vld [vmem:[#allocation5 + $0x2d0] sm:$0xff] }
  0xdb   :  { %1195 = vmatpush2.msra.mxu0 %v4740_v14  ;;  %1364 = vmatpush1.msra.mxu1 %v4741_v7  ;;  %v3590_v14 = vand.u32 4294901760, %v135_v24  ;;  %v4775_v7 = vand.u32 4294901760, %v3172_v36  ;;  %v3601_v32 = vsub.f32 %v137_v17, %v3580_v63  ;;  %v3606_v36 = vsub.f32 %v138_v16, %v3578_v57 }
  0xdc   :  { %1199 = vmatprep.subr.mxu0 %v4743_v30  ;;  %1366 = vmatprep.subr.mxu1 %v4744_v53  ;;  %v3595_v30 = vand.u32 4294901760, %v134_v50  ;;  %v131_v53 = vld [vmem:[#allocation5 + $0x2c0] sm:$0xff]  ;;  %v4401_v52 = vand.u32 4294901760, %v3612_v33  ;;  %v4792_v16 = vand.u32 4294901760, %v3257_v1  ;;  %v3661_v1 = vand.u32 4294901760, %v128_v10 }
  0xdd   :  { %1203 = vmatpush2.msra.mxu0 %v4746_v60  ;;  %1368 = vmatpush2.msra.mxu1 %v4747_v28  ;;  %v4778_v60 = vld [vmem:[#allocation67_spill] sm:$0xff]  ;;  %v3603_v28 = vand.u32 4294901760, %v133_v58 }
  0xde   :  { %1207 = vmatprep.subr.mxu0 %v4749_v25  ;;  %1370 = vmatprep.subr.mxu1 %v4750_v31  ;;  %v4780_v25 = vand.u32 4294901760, %v3201_v47  ;;  %v4781_v31 = vld [vmem:[#allocation69_spill] sm:$0xff]  ;;  %v4786_v47 = vand.u32 4294901760, %v3223_v41  ;;  %v3630_v20 = vsub.f32 %v134_v50, %v3595_v30  ;;  %v4403_v41 = vand.u32 4294901760, %v3601_v32  ;;  %4798 = vst [vmem:[#allocation82_spill] sm:$0xff] %v3661_v1 }
  0xdf   :  { %1211 = vmatpush2.msra.mxu0 %v4752_v35  ;;  %1372 = vmatpush2.msra.mxu1 %v4753_v19  ;;  %4779 = vst [vmem:[#allocation28_spill] sm:$0xff] %v3603_v28  ;;  %v4783_v35 = vld [vmem:[#allocation71_spill] sm:$0xff]  ;;  %v3618_v19 = vsub.f32 %v135_v24, %v3590_v14 }
  0xe0   :  { %1215 = vmatprep.subr.mxu0 %v4755_v45  ;;  %1374 = vmatprep.subr.mxu1 %v4756_v18  ;;  %v3622_v45 = vand.u32 4294901760, %v131_v53  ;;  %v129_v18 = vld [vmem:[#allocation5 + $0x2b0] sm:$0xff] }
  0xe1   :  { %1219 = vmatpush2.msra.mxu0 %v4757_v59  ;;  %1376 = vmatpush2.msra.mxu1 %v4758_v3  ;;  %v3627_v59 = vand.u32 4294901760, %v130_v23  ;;  %v127_v3 = vld [vmem:[#allocation5 + $0x2a0] sm:$0xff] }
  0xe2   :  { %1223 = vmatprep.subr.mxu0 %v4760_v5  ;;  %1378 = vmatprep.subr.mxu1 %v4761_v9  ;;  %4785 = vst [vmem:[#allocation30_spill] sm:$0xff] %v3622_v45  ;;  %v3636_v5 = vsub.f32 %v133_v58, %v3603_v28  ;;  %v4404_v9 = vand.u32 4294901760, %v3606_v36  ;;  %v3650_v17 = vsub.f32 %v131_v53, %v3622_v45 }
  0xe3   :  { %1227 = vmatpush2.msra.mxu0 %v4763_v11  ;;  %1380 = vmatpush2.msra.mxu1 %v4764_v15  ;;  %4787 = vst [vmem:[#allocation13_spill] sm:$0xff] %v3627_v59  ;;  %v4790_v11 = vld [vmem:[#allocation77_spill] sm:$0xff]  ;;  %v3643_v15 = vand.u32 4294901760, %v129_v18  ;;  %v3665_v50 = vsub.f32 %v130_v23, %v3627_v59  ;;  %v3694_v23 = vand.u32 4294901760, %v125_v34 }
  0xe4   :  { %1231 = vmatprep.subr.mxu0 %v4765_v0  ;;  %1382 = vmatprep.subr.mxu1 %v4766_v22  ;;  %v3652_v0 = vand.u32 4294901760, %v127_v3  ;;  %v4400_v22 = vand.u32 4294901760, %v3618_v19  ;;  %v3673_v58 = vsub.f32 %v3606_v36, %v4404_v9 }
  0xe5   :  { %1235 = vmatpush2.msra.mxu0 %v4767_v8  ;;  %1384 = vmatpush2.msra.mxu1 %v4768_v42  ;;  %4791 = vst [vmem:[#allocation32_spill] sm:$0xff] %v3643_v15  ;;  %v3656_v8 = vsub.f32 %v132_v61, %v3620_v40  ;;  %v4795_v42 = vld [vmem:[#allocation98_spill] sm:$0xff]  ;;  %v3685_v53 = vsub.f32 %v129_v18, %v3643_v15  ;;  %4805 = vst [vmem:[#allocation89_spill] sm:$0xff] %v3694_v23 }
  0xe6   :  { %1239 = vmatprep.subr.mxu0 %v4769_v48  ;;  %1386 = vmatprep.subr.mxu1 %v4770_v54  ;;  %4794 = vst [vmem:[#allocation34_spill] sm:$0xff] %v3652_v0  ;;  %v4796_v24 = vand.u32 4294901760, %v4795_v42  ;;  %v4797_v48 = vld [vmem:[#allocation81_spill] sm:$0xff]  ;;  %v4399_v54 = vand.u32 4294901760, %v3630_v20  ;;  %v3704_v18 = vsub.f32 %v3618_v19, %v4400_v22  ;;  %v1550_v42 = vand.u32 4294901760, %v3673_v58  ;;  %v121_v58 = vld [vmem:[#allocation5 + $0x270] sm:$0xff] }
  0xe7   :  { %1243 = vmatpush2.msra.mxu0 %v4771_v6  ;;  %1388 = vmatpush2.msra.mxu1 %v4772_v55  ;;  %v4799_v6 = vand.u32 4294901760, %v3279_v62  ;;  %v4800_v55 = vld [vmem:[#allocation83_spill] sm:$0xff]  ;;  %v4803_v62 = vld [vmem:[#allocation97_spill] sm:$0xff] }
  0xe8   :  { %1247 = vmatprep.subr.mxu0 %v4773_v49  ;;  %1390 = vmatprep.subr.mxu1 %v4774_v27  ;;  %v3678_v49 = vsub.f32 %v3601_v32, %v4403_v41  ;;  %v4397_v27 = vand.u32 4294901760, %v3636_v5 }
  0xe9   :  { %1251 = vmatpush2.msra.mxu0 %v4775_v7  ;;  %1392 = vmatpush2.msra.mxu1 %v4776_v13  ;;  %v123_v7 = vld [vmem:[#allocation5 + $0x280] sm:$0xff]  ;;  %v4801_v13 = vld [vmem:[#allocation99_spill] sm:$0xff] }
  0xea   :  { %1255 = vmatprep.subr.mxu0 %v4777_v12  ;;  %1394 = vmatprep.subr.mxu1 %v4778_v60  ;;  %v4802_v61 = vand.u32 4294901760, %v4801_v13  ;;  %v3690_v12 = vsub.f32 %v3612_v33, %v4401_v52 }
  0xeb   :  { %1259 = vmatpush2.msra.mxu0 %v4780_v25  ;;  %1396 = vmatpush2.msra.mxu1 %v4781_v31  ;;  %v124_v25 = vld [vmem:[#allocation5 + $0x288] sm:$0xff]  ;;  %v4806_v31 = vld [vmem:[#allocation85_spill] sm:$0xff] }
  0xec   :  { %1263 = vmatprep.subr.mxu0 %v4782_v46  ;;  %1398 = vmatprep.subr.mxu1 %v4783_v35  ;;  %v4807_v46 = vld [vmem:[#allocation96_spill] sm:$0xff]  ;;  %v3699_v35 = vsub.f32 %v127_v3, %v3652_v0  ;;  %v3715_v3 = vand.u32 4294901760, %v123_v7 }
  0xed   :  { %1267 = vmatpush2.msra.mxu0 %v4786_v47  ;;  %1400 = vmatpush2.msra.mxu1 %v4652_v56  ;;  %v4789_v56 = vand.u32 4294901760, %v3242_v51  ;;  %v126_v51 = vld [vmem:[#allocation5 + $0x298] sm:$0xff]  ;;  %v4396_v47 = vand.u32 4294901760, %v3656_v8 }
  0xee   :  { %1271 = vmatprep.subr.mxu0 %v4788_v4  ;;  %1402 = vmatprep.subr.mxu1 %v4653_v44  ;;  %v4793_v44 = vld [vmem:[#allocation79_spill] sm:$0xff]  ;;  %v3692_v60 = vand.u32 4294901760, %v126_v51  ;;  %v4395_v4 = vand.u32 4294901760, %v3650_v17  ;;  %4809 = vst [vmem:[#allocation92_spill] sm:$0xff] %v3715_v3 }
  0xef   :  { %1275 = vmatpush2.msra.mxu0 %v4789_v56  ;;  %1404 = vmatpush2.msra.mxu1 %v4790_v11  ;;  %v4808_v56 = vld [vmem:[#allocation87_spill] sm:$0xff]  ;;  %v3713_v11 = vsub.f32 %v3630_v20, %v4399_v54 }
  0xf0   :  { %1279 = vmatprep.subr.mxu0 %v4792_v16  ;;  %1406 = vmatprep.subr.mxu1 %v4793_v44  ;;  %4804 = vst [vmem:[#allocation88_spill] sm:$0xff] %v3692_v60  ;;  %v4398_v16 = vand.u32 4294901760, %v3665_v50  ;;  %v3719_v44 = vsub.f32 %v128_v10, %v3661_v1  ;;  %v1562_v10 = vand.u32 4294901760, %v3690_v12  ;;  %v3740_v13 = vsub.f32 %v126_v51, %v3692_v60  ;;  %v119_v12 = vld [vmem:[#allocation5 + $0x260] sm:$0xff] }
  0xf1   :  { %1283 = vmatpush2.msra.mxu0 %v4796_v24  ;;  %1408 = vmatpush2.msra.mxu1 %v4797_v48  ;;  %v1556_v24 = vand.u32 4294901760, %v3678_v49  ;;  %v3728_v48 = vsub.f32 %v3636_v5, %v4397_v27  ;;  %v4402_v49 = vand.u32 4294901760, %v3685_v53  ;;  %v4405_v51 = vand.u32 4294901760, %v3699_v35 }
  0xf2   :  { %1287 = vmatprep.subr.mxu0 %v4799_v6  ;;  %1410 = vmatprep.subr.mxu1 %v4800_v55  ;;  %v3730_v6 = vand.u32 4294901760, %v124_v25  ;;  %v122_v55 = vld [vmem:[#allocation5 + $0x278] sm:$0xff] }
  0xf3   :  { %1291 = vmatpush2.msra.mxu0 %v4802_v61  ;;  %1293 = vmatprep.mubr.f32.mxu0 %v4803_v62  ;;  %v3748_v61 = vsub.f32 %v3656_v8, %v4396_v47  ;;  %v3771_v47 = vand.u32 4294901760, %v122_v55 }
  0xf4   :  { %1412 = vmatpush2.msra.mxu1 %v4806_v31  ;;  %1295 = vmatmul.mubr.f32.vlgmr.msra.gmra.mxu0 %v4807_v46  ;;  %4810 = vst [vmem:[#allocation94_spill] sm:$0xff] %v3730_v6  ;;  %v3760_v31 = vsub.f32 %v123_v7, %v3715_v3  ;;  %v117_v7 = vld [vmem:[#allocation5 + $0x250] sm:$0xff]  ;;  %v3776_v27 = vsub.f32 %v124_v25, %v3730_v6 }
  0xf5   :  { %1414 = vmatprep.subr.mxu1 %v4808_v56  ;;  %1439 = vmatprep.subr.mxu0 %v3578_v57  ;;  %v120_v56 = vld [vmem:[#allocation5 + $0x268] sm:$0xff]  ;;  %4812 = vst [vmem:[#allocation75_spill] sm:$0xff] %v3771_v47  ;;  %v3819_v22 = vsub.f32 %v122_v55, %v3771_v47  ;;  %v42_v55 = vld [vmem:[#allocation2 + $0x8] sm:$0x7] }
  0xf6   :  { %1416 = vmatpush2.msra.mxu1 %v3113_v37  ;;  %1441 = vmatpush1.msra.mxu0 %v3580_v63  ;;  %v3736_v37 = vsub.f32 %v125_v34, %v3694_v23  ;;  %v3753_v34 = vsub.f32 %v3650_v17, %v4395_v4  ;;  %4811 = vst [vmem:[#allocation73_spill] sm:$0xff] %v3760_v31  ;;  %v4406_v4 = vand.u32 4294901760, %v3719_v44  ;;  %v3793_v52 = vand.u32 4294901760, %v120_v56 }
  0xf7   :  { %1418 = vmatprep.subr.mxu1 %v4661_v26  ;;  %1443 = vmatprep.subr.mxu0 %v3585_v39  ;;  %v1568_v26 = vand.u32 4294901760, %v3704_v18  ;;  %v3765_v18 = vsub.f32 %v3665_v50, %v4398_v16  ;;  %v3785_v16 = vand.u32 4294901760, %v119_v12 }
  0xf8   :  { %1420 = vmatpush2.msra.mxu1 %v4663_v21  ;;  %1445 = vmatpush1.msra.mxu0 %v3590_v14  ;;  %v1574_v21 = vand.u32 4294901760, %v3713_v11  ;;  %v3773_v11 = vand.u32 4294901760, %v121_v58  ;;  %v1592_v25 = vand.u32 4294901760, %v3753_v34  ;;  %4815 = vst [vmem:[#allocation91_spill] sm:$0xff] %v3793_v52  ;;  %v115_v34 = vld [vmem:[#allocation5 + $0x240] sm:$0xff] }
  0xf9   :  { %1422 = vmatprep.subr.mxu1 %v4665_v43  ;;  %1447 = vmatprep.subr.mxu0 %v3595_v30  ;;  %v1580_v43 = vand.u32 4294901760, %v3728_v48  ;;  %4814 = vst [vmem:[#allocation90_spill] sm:$0xff] %v3785_v16  ;;  %v118_v48 = vld [vmem:[#allocation5 + $0x258] sm:$0xff]  ;;  %v1598_v41 = vand.u32 4294901760, %v3765_v18  ;;  %v3824_v9 = vsub.f32 %v119_v12, %v3785_v16  ;;  %v3840_v12 = vand.u32 4294901760, %v115_v34 }
  0xfa   :  { %1424 = vmatpush2.msra.mxu1 %v4667_v29  ;;  %1449 = vmatpush1.msra.mxu0 %v3603_v28  ;;  %4813 = vst [vmem:[#allocation11_spill] sm:$0xff] %v3773_v11  ;;  %v3783_v29 = vsub.f32 %v3685_v53, %v4402_v49  ;;  %v3798_v49 = vsub.f32 %v3699_v35, %v4405_v51  ;;  %v3867_v28 = vand.u32 4294901760, %v42_v55 }
  0xfb   :  { %1426 = vmatprep.subr.mxu1 %v3181_v2  ;;  %1451 = vmatprep.subr.mxu0 %v3620_v40  ;;  %v1586_v2 = vand.u32 4294901760, %v3748_v61  ;;  %v116_v61 = vld [vmem:[#allocation5 + $0x248] sm:$0xff]  ;;  %v3813_v51 = vsub.f32 %v121_v58, %v3773_v11  ;;  %4818 = vst [vmem:[#allocation14_spill] sm:$0xff] %v3824_v9  ;;  %4821 = vst [vmem:[#allocation36_spill] sm:$0xff] %v3840_v12  ;;  %v111_v40 = vld [vmem:[#allocation5 + $0x220] sm:$0xff] }
  0xfc   :  { %1428 = vmatpush2.msra.mxu1 %v3197_v38  ;;  %1430 = vmatprep.mubr.f32.mxu1 %v4803_v62  ;;  %v3806_v38 = vsub.f32 %v3719_v44, %v4406_v4  ;;  %v3808_v62 = vand.u32 4294901760, %v117_v7  ;;  %v113_v4 = vld [vmem:[#allocation5 + $0x230] sm:$0xff]  ;;  %v1604_v54 = vand.u32 4294901760, %v3783_v29  ;;  %v3838_v29 = vand.u32 4294901760, %v116_v61  ;;  %4825 = vst [vmem:[#allocation38_spill] sm:$0xff] %v3867_v28 }
  0xfd   :  { %1453 = vmatpush1.msra.mxu0 %v3622_v45  ;;  %1432 = vmatmul.mubr.f32.vlgmr.msra.gmra.mxu1 %v4807_v46  ;;  %v3815_v46 = vand.u32 4294901760, %v118_v48  ;;  %v3843_v45 = vsub.f32 %v120_v56, %v3793_v52  ;;  %v4824_v56 = vand.u32 4294901760, %v3776_v27 }
  0xfe   :  { %4816 = vst [vmem:[#allocation93_spill] sm:$0xff] %v3808_v62  ;;  %1455 = vmatprep.subr.mxu0 %v3627_v59  ;;  %1551 = vmatprep.subr.mxu1 %v1550_v42  ;;  %v4819_v42 = vand.u32 4294901760, %v3740_v13  ;;  %v4820_v59 = vand.u32 4294901760, %v3736_v37 }
  0xff   :  { %4817 = vst [vmem:[#allocation95_spill] sm:$0xff] %v3815_v46  ;;  %1457 = vmatpush1.msra.mxu0 %v3643_v15  ;;  %1557 = vmatpush1.msra.mxu1 %v1556_v24  ;;  %v1616_v24 = vand.u32 4294901760, %v3798_v49  ;;  %v114_v15 = vld [vmem:[#allocation5 + $0x238] sm:$0xff]  ;;  %4822 = vst [vmem:[#allocation15_spill] sm:$0xff] %v3843_v45 }
 0x100   :  { %v3829_v58 = vsub.f32 %v3740_v13, %v4819_v42  ;;  %v3834_v18 = vsub.f32 %v3736_v37, %v4820_v59  ;;  %1459 = vmatprep.subr.mxu0 %v3661_v1  ;;  %1563 = vmatprep.subr.mxu1 %v1562_v10  ;;  %v1610_v59 = vand.u32 4294901760, %v3806_v38  ;;  %v3848_v42 = vsub.f32 %v117_v7, %v3808_v62  ;;  %v112_v7 = vld [vmem:[#allocation5 + $0x228] sm:$0xff] }
 0x101   :  { %1461 = vmatpush1.msra.mxu0 %v3652_v0  ;;  %1569 = vmatpush1.msra.mxu1 %v1568_v26  ;;  %v4823_v10 = vand.u32 4294901760, %v3760_v31  ;;  %v3855_v1 = vand.u32 4294901760, %v113_v4  ;;  %v3861_v26 = vsub.f32 %v3776_v27, %v4824_v56  ;;  %v3865_v0 = vsub.f32 %v118_v48, %v3815_v46  ;;  %v109_v56 = vld [vmem:[#allocation5 + $0x210] sm:$0xff] }
 0x102   :  { %1463 = vmatprep.subr.mxu0 %v3692_v60  ;;  %1575 = vmatprep.subr.mxu1 %v1574_v21  ;;  %v1628_v21 = vand.u32 4294901760, %v3834_v18  ;;  %v3872_v60 = vand.u32 4294901760, %v114_v15  ;;  %v3877_v38 = vsub.f32 %v115_v34, %v3840_v12  ;;  %v4828_v34 = vand.u32 4294901760, %v3813_v51 }
 0x103   :  { %v3853_v49 = vsub.f32 %v3760_v31, %v4823_v10  ;;  %1465 = vmatpush1.msra.mxu0 %v3694_v23  ;;  %1581 = vmatpush1.msra.mxu1 %v1580_v43  ;;  %v1622_v10 = vand.u32 4294901760, %v3829_v58  ;;  %v3880_v31 = vand.u32 4294901760, %v111_v40  ;;  %v110_v23 = vld [vmem:[#allocation5 + $0x218] sm:$0xff]  ;;  %v3883_v43 = vsub.f32 %v116_v61, %v3838_v29 }
 0x104   :  { %1467 = vmatprep.subr.mxu0 %v3730_v6  ;;  %1587 = vmatprep.subr.mxu1 %v1586_v2  ;;  %4826 = vst [vmem:[#allocation16_spill] sm:$0xff] %v3877_v38  ;;  %v3888_v58 = vsub.f32 %v113_v4, %v3855_v1  ;;  %v3890_v2 = vand.u32 4294901760, %v112_v7  ;;  %v1634_v48 = vand.u32 4294901760, %v3861_v26  ;;  %v4827_v61 = vand.u32 4294901760, %v3819_v22  ;;  %v107_v6 = vld [vmem:[#allocation5 + $0x200] sm:$0xff] }
 0x105   :  { %1469 = vmatpush1.msra.mxu0 %v3715_v3  ;;  %1593 = vmatpush1.msra.mxu1 %v1592_v25  ;;  %v1640_v18 = vand.u32 4294901760, %v3853_v49  ;;  %v108_v49 = vld [vmem:[#allocation5 + $0x208] sm:$0xff]  ;;  %v3900_v4 = vsub.f32 %v42_v55, %v3867_v28  ;;  %v4829_v55 = vand.u32 4294901760, %v3843_v45 }
 0x106   :  { %1471 = vmatprep.subr.mxu0 %v3771_v47  ;;  %1599 = vmatprep.subr.mxu1 %v1598_v41  ;;  %v1645_v3 = vsub.f32 %v3819_v22, %v4827_v61  ;;  %v1651_v41 = vsub.f32 %v3813_v51, %v4828_v34  ;;  %v3906_v47 = vand.u32 4294901760, %v110_v23  ;;  %v3910_v61 = vsub.f32 %v114_v15, %v3872_v60 }
 0x107   :  { %1473 = vmatpush1.msra.mxu0 %v3773_v11  ;;  %1605 = vmatpush1.msra.mxu1 %v1604_v54  ;;  %v1657_v25 = vsub.f32 %v3843_v45, %v4829_v55  ;;  %v3917_v54 = vsub.f32 %v111_v40, %v3880_v31  ;;  %v3919_v11 = vand.u32 4294901760, %v109_v56  ;;  %v4830_v15 = vand.u32 4294901760, %v3824_v9 }
 0x108   :  { %1475 = vmatprep.subr.mxu0 %v3793_v52  ;;  %1611 = vmatprep.subr.mxu1 %v1610_v59  ;;  %v3926_v52 = vand.u32 4294901760, %v108_v49  ;;  %v3928_v59 = vand.u32 4294901760, %v107_v6  ;;  %v3931_v55 = vsub.f32 %v112_v7, %v3890_v2  ;;  %v1646_v40 = vand.u32 4294901760, %v1645_v3 }
 0x109   :  { %1477 = vmatpush1.msra.mxu0 %v3785_v16  ;;  %1617 = vmatpush1.msra.mxu1 %v1616_v24  ;;  %v1663_v26 = vsub.f32 %v3824_v9, %v4830_v15  ;;  %v4832_v34 = vand.u32 4294901760, %v3865_v0  ;;  %v4445_v24 = vand.u32 4294901760, %v3877_v38  ;;  %v1652_v15 = vand.u32 4294901760, %v1651_v41 }
 0x10a   :  { %4831 = vst [vmem:[#allocation40_spill] sm:$0xff] %v3931_v55  ;;  %1479 = vmatprep.subr.mxu0 %v3815_v46  ;;  %1623 = vmatprep.subr.mxu1 %v1622_v10  ;;  %v4833_v9 = vand.u32 4294901760, %v3848_v42  ;;  %v3945_v3 = vsub.f32 %v110_v23, %v3906_v47  ;;  %v1658_v10 = vand.u32 4294901760, %v1657_v25  ;;  %v4834_v45 = vand.u32 4294901760, %v3883_v43 }
 0x10b   :  { %v1669_v16 = vsub.f32 %v3865_v0, %v4832_v34  ;;  %1481 = vmatpush1.msra.mxu0 %v3808_v62  ;;  %1629 = vmatpush1.msra.mxu1 %v1628_v21  ;;  %v3949_v34 = vsub.f32 %v109_v56, %v3919_v11  ;;  %v4446_v41 = vand.u32 4294901760, %v3888_v58  ;;  %v3957_v23 = vsub.f32 %v107_v6, %v3928_v59 }
 0x10c   :  { %v1675_v7 = vsub.f32 %v3848_v42, %v4833_v9  ;;  %1483 = vmatprep.subr.mxu0 %v3838_v29  ;;  %1635 = vmatprep.subr.mxu1 %v1634_v48  ;;  %v1681_v21 = vsub.f32 %v3883_v43, %v4834_v45  ;;  %v1664_v9 = vand.u32 4294901760, %v1663_v26  ;;  %v3961_v48 = vsub.f32 %v108_v49, %v3926_v52 }
 0x10d   :  { %1485 = vmatpush1.msra.mxu0 %v3840_v12  ;;  %1641 = vmatpush1.msra.mxu1 %v1640_v18  ;;  %4835 = vst [vmem:[#allocation17_spill] sm:$0xff] %v3957_v23  ;;  %v1670_v56 = vand.u32 4294901760, %v1669_v16  ;;  %v1687_v45 = vsub.f32 %v3877_v38, %v4445_v24  ;;  %v4836_v25 = vand.u32 4294901760, %v3900_v4  ;;  %v4447_v6 = vand.u32 4294901760, %v3917_v54 }
 0x10e   :  { %1487 = vmatprep.subr.mxu0 %v3872_v60  ;;  %1647 = vmatprep.subr.mxu1 %v1646_v40  ;;  %v1676_v26 = vand.u32 4294901760, %v1675_v7  ;;  %v4837_v49 = vand.u32 4294901760, %v3910_v61  ;;  %v4448_v16 = vand.u32 4294901760, %v3945_v3  ;;  %v1682_v40 = vand.u32 4294901760, %v1681_v21 }
 0x10f   :  { %v1538_v18 = vsub.f32 %v3900_v4, %v4836_v25  ;;  %1489 = vmatpush1.msra.mxu0 %v3855_v1  ;;  %1653 = vmatpush1.msra.mxu1 %v1652_v15  ;;  %v1699_v25 = vsub.f32 %v3888_v58, %v4446_v41  ;;  %v4838_v15 = vand.u32 4294901760, %v3931_v55  ;;  %v1711_v41 = vsub.f32 %v3917_v54, %v4447_v6 }
 0x110   :  { %v1693_v46 = vsub.f32 %v3910_v61, %v4837_v49  ;;  %1491 = vmatprep.subr.mxu0 %v3890_v2  ;;  %1659 = vmatprep.subr.mxu1 %v1658_v10  ;;  %v4449_v49 = vand.u32 4294901760, %v3961_v48  ;;  %v1688_v10 = vand.u32 4294901760, %v1687_v45  ;;  %v4839_v45 = vand.u32 4294901760, %v3949_v34 }
 0x111   :  { %1493 = vmatpush1.msra.mxu0 %v3880_v31  ;;  %1665 = vmatpush1.msra.mxu1 %v1664_v9  ;;  %v1705_v7 = vsub.f32 %v3931_v55, %v4838_v15  ;;  %v1539_v21 = vand.u32 4294901760, %v1538_v18  ;;  %v1717_v15 = vsub.f32 %v3945_v3, %v4448_v16  ;;  %v4450_v6 = vmov 0.0  }
 0x112   :  { %1495 = vmatprep.subr.mxu0 %v3906_v47  ;;  %1671 = vmatprep.subr.mxu1 %v1670_v56  ;;  %v1694_v9 = vand.u32 4294901760, %v1693_v46  ;;  %v1700_v56 = vand.u32 4294901760, %v1699_v25  ;;  %v1723_v18 = vsub.f32 %v3949_v34, %v4839_v45  ;;  %v1729_v46 = vsub.f32 %v3961_v48, %v4449_v49  ;;  %v4856_v49 = vld [vmem:[#allocation11_spill] sm:$0xff] }
 0x113   :  { %1497 = vmatpush1.msra.mxu0 %v3919_v11  ;;  %1677 = vmatpush1.msra.mxu1 %v1676_v26  ;;  %v1706_v24 = vand.u32 4294901760, %v1705_v7  ;;  %v1712_v26 = vand.u32 4294901760, %v1711_v41  ;;  %v1718_v45 = vand.u32 4294901760, %v1717_v15  ;;  %v4846_v15 = vld [vmem:[#allocation32_spill] sm:$0xff] }
 0x114   :  { %1499 = vmatprep.subr.mxu0 %v3926_v52  ;;  %1683 = vmatprep.subr.mxu1 %v1682_v40  ;;  %v4840_v40 = vand.u32 4294901760, %v3957_v23  ;;  %v1724_v16 = vand.u32 4294901760, %v1723_v18  ;;  %v1730_v7 = vand.u32 4294901760, %v1729_v46  ;;  %v4848_v18 = vld [vmem:[#allocation82_spill] sm:$0xff] }
 0x115   :  { %1501 = vmatpush1.msra.mxu0 %v3928_v59  ;;  %1534 = vmatprep.mubr.f32.mxu0 %v4450_v6  ;;  %v4849_v46 = vld [vmem:[#allocation14_spill] sm:$0xff] }
 0x116   :  { %1689 = vmatpush1.msra.mxu1 %v1688_v10  ;;  %1540 = vmatmul.mubr.f32.vlgmr.msra.gmra.mxu0 %v1539_v21  ;;  %v1735_v25 = vsub.f32 %v3957_v23, %v4840_v40  ;;  %v4843_v10 = vld [vmem:[#allocation73_spill] sm:$0xff]  ;;  %v4844_v21 = vld [vmem:[#allocation30_spill] sm:$0xff]  ;;  %v4851_v40 = vld [vmem:[#allocation88_spill] sm:$0xff] }
 0x117   :  { %1695 = vmatprep.subr.mxu1 %v1694_v9  ;;  %1780 = vmatprep.subr.mxu0 %v3606_v36  ;;  %v4845_v9 = vld [vmem:[#allocation13_spill] sm:$0xff] }
 0x118   :  { %1701 = vmatpush1.msra.mxu1 %v1700_v56  ;;  %1783 = vmatpush1.msra.mxu0 %v3601_v32  ;;  %v1736_v41 = vand.u32 4294901760, %v1735_v25  ;;  %v4847_v56 = vld [vmem:[#allocation15_spill] sm:$0xff]  ;;  %v4852_v25 = vld [vmem:[#allocation89_spill] sm:$0xff] }
 0x119   :  { %1707 = vmatprep.subr.mxu1 %v1706_v24  ;;  %1786 = vmatprep.subr.mxu0 %v3612_v33  ;;  %v4841_v24 = vld [vmem:[#allocation28_spill] sm:$0xff] }
 0x11a   :  { %1713 = vmatpush1.msra.mxu1 %v1712_v26  ;;  %1789 = vmatpush1.msra.mxu0 %v3618_v19  ;;  %v4850_v26 = vld [vmem:[#allocation34_spill] sm:$0xff] }
 0x11b   :  { %1719 = vmatprep.subr.mxu1 %v1718_v45  ;;  %1792 = vmatprep.subr.mxu0 %v3630_v20  ;;  %v4853_v45 = vld [vmem:[#allocation94_spill] sm:$0xff] }
 0x11c   :  { %1725 = vmatpush1.msra.mxu1 %v1724_v16  ;;  %1795 = vmatpush1.msra.mxu0 %v3636_v5  ;;  %v4842_v16 = vld [vmem:[#allocation12_spill] sm:$0xff] }
 0x11d   :  { %1731 = vmatprep.subr.mxu1 %v1730_v7  ;;  %1798 = vmatprep.subr.mxu0 %v3656_v8  ;;  %v4854_v7 = vld [vmem:[#allocation92_spill] sm:$0xff] }
 0x11e   :  { %1737 = vmatpush1.msra.mxu1 %v1736_v41  ;;  %1770 = vmatprep.mubr.f32.mxu1 %v4450_v6  ;;  %v4855_v41 = vld [vmem:[#allocation75_spill] sm:$0xff] }
 0x11f   :  { %1801 = vmatpush1.msra.mxu0 %v3650_v17  ;;  %1772 = vmatmul.mubr.f32.vlgmr.msra.gmra.mxu1 %v3867_v28  ;;  %v4857_v6 = vld [vmem:[#allocation91_spill] sm:$0xff]  ;;  %v4858_v28 = vld [vmem:[#allocation90_spill] sm:$0xff] }
 0x120   :  { %1804 = vmatprep.subr.mxu0 %v3665_v50  ;;  %1916 = vmatprep.subr.mxu1 %v3578_v57 }
 0x121   :  { %1807 = vmatpush1.msra.mxu0 %v3685_v53  ;;  %1918 = vmatpush1.msra.mxu1 %v3580_v63 }
 0x122   :  { %1810 = vmatprep.subr.mxu0 %v3719_v44  ;;  %1920 = vmatprep.subr.mxu1 %v3585_v39 }
 0x123   :  { %1813 = vmatpush1.msra.mxu0 %v3699_v35  ;;  %1922 = vmatpush1.msra.mxu1 %v3590_v14 }
 0x124   :  { %1816 = vmatprep.subr.mxu0 %v3740_v13  ;;  %1924 = vmatprep.subr.mxu1 %v3595_v30 }
 0x125   :  { %1819 = vmatpush1.msra.mxu0 %v3736_v37  ;;  %1926 = vmatpush1.msra.mxu1 %v4841_v24 }
 0x126   :  { %1822 = vmatprep.subr.mxu0 %v3776_v27  ;;  %1928 = vmatprep.subr.mxu1 %v4842_v16 }
 0x127   :  { %1825 = vmatpush1.msra.mxu0 %v4843_v10  ;;  %1930 = vmatpush1.msra.mxu1 %v4844_v21 }
 0x128   :  { %1828 = vmatprep.subr.mxu0 %v3819_v22  ;;  %1932 = vmatprep.subr.mxu1 %v4845_v9 }
 0x129   :  { %1831 = vmatpush1.msra.mxu0 %v3813_v51  ;;  %1934 = vmatpush1.msra.mxu1 %v4846_v15 }
 0x12a   :  { %1834 = vmatprep.subr.mxu0 %v4847_v56  ;;  %1936 = vmatprep.subr.mxu1 %v4848_v18 }
 0x12b   :  { %1837 = vmatpush1.msra.mxu0 %v4849_v46  ;;  %1938 = vmatpush1.msra.mxu1 %v4850_v26 }
 0x12c   :  { %1840 = vmatprep.subr.mxu0 %v3865_v0  ;;  %1940 = vmatprep.subr.mxu1 %v4851_v40 }
 0x12d   :  { %1843 = vmatpush1.msra.mxu0 %v3848_v42  ;;  %1942 = vmatpush1.msra.mxu1 %v4852_v25 }
 0x12e   :  { %1846 = vmatprep.subr.mxu0 %v3883_v43  ;;  %1944 = vmatprep.subr.mxu1 %v4853_v45 }
 0x12f   :  { %1849 = vmatpush1.msra.mxu0 %v3877_v38  ;;  %1946 = vmatpush1.msra.mxu1 %v4854_v7  ;;  %v4859_v38 = vld [vmem:[#allocation95_spill] sm:$0xff] }
 0x130   :  { %1852 = vmatprep.subr.mxu0 %v3910_v61  ;;  %1948 = vmatprep.subr.mxu1 %v4855_v41 }
 0x131   :  { %1855 = vmatpush1.msra.mxu0 %v3888_v58  ;;  %1950 = vmatpush1.msra.mxu1 %v4856_v49 }
 0x132   :  { %1858 = vmatprep.subr.mxu0 %v3931_v55  ;;  %1952 = vmatprep.subr.mxu1 %v4857_v6  ;;  %v4860_v55 = vmov 0.0  }
 0x133   :  { %1861 = vmatpush1.msra.mxu0 %v3917_v54  ;;  %1954 = vmatpush1.msra.mxu1 %v4858_v28 }
 0x134   :  { %1864 = vmatprep.subr.mxu0 %v3945_v3  ;;  %1956 = vmatprep.subr.mxu1 %v4859_v38  ;;  %v4861_v38 = vand.u32 4294901760, %v3606_v36  ;;  %v4865_v36 = vand.u32 4294901760, %v3630_v20  ;;  %v4869_v20 = vand.u32 4294901760, %v3900_v4 }
 0x135   :  { %1867 = vmatpush1.msra.mxu0 %v3949_v34  ;;  %1958 = vmatpush1.msra.mxu1 %v3808_v62  ;;  %v4862_v62 = vand.u32 4294901760, %v3601_v32  ;;  %v4866_v32 = vand.u32 4294901760, %v3636_v5  ;;  %v4871_v5 = vand.u32 4294901760, %v3685_v53  ;;  %v4881_v53 = vand.u32 4294901760, %v4849_v46 }
 0x136   :  { %1870 = vmatprep.subr.mxu0 %v3961_v48  ;;  %1960 = vmatprep.subr.mxu1 %v3838_v29 }
 0x137   :  { %1873 = vmatpush1.msra.mxu0 %v3957_v23  ;;  %1906 = vmatprep.mubr.f32.mxu0 %v4860_v55  ;;  %v4863_v23 = vand.u32 4294901760, %v3612_v33  ;;  %v4867_v33 = vand.u32 4294901760, %v3656_v8  ;;  %v4872_v8 = vand.u32 4294901760, %v3719_v44  ;;  %v4884_v44 = vand.u32 4294901760, %v3883_v43 }
 0x138   :  { %1962 = vmatpush1.msra.mxu1 %v3840_v12  ;;  %1909 = vmatmul.mubr.f32.vlgmr.msra.gmra.mxu0 %v3900_v4  ;;  %v4864_v12 = vand.u32 4294901760, %v3618_v19  ;;  %v4868_v19 = vand.u32 4294901760, %v3650_v17  ;;  %v4873_v17 = vand.u32 4294901760, %v3699_v35  ;;  %v4883_v35 = vand.u32 4294901760, %v3848_v42  ;;  %v4893_v4 = vld [vmem:[#allocation95_spill] sm:$0xff] }
 0x139   :  { %1964 = vmatprep.subr.mxu1 %v3872_v60  ;;  %2024 = vmatprep.subr.mxu0 %v4861_v38  ;;  %v4891_v38 = vand.u32 4294901760, %v3917_v54  ;;  %v4892_v43 = vand.u32 4294901760, %v3945_v3  ;;  %v4900_v3 = vld [vmem:[#allocation38_spill] sm:$0xff] }
 0x13a   :  { %1966 = vmatpush1.msra.mxu1 %v3855_v1  ;;  %2028 = vmatpush1.msra.mxu0 %v4862_v62  ;;  %v4870_v62 = vand.u32 4294901760, %v3665_v50  ;;  %v4874_v50 = vand.u32 4294901760, %v3740_v13 }
 0x13b   :  { %1968 = vmatprep.subr.mxu1 %v3890_v2  ;;  %2032 = vmatprep.subr.mxu0 %v4863_v23  ;;  %v4896_v23 = vand.u32 4294901760, %v3961_v48  ;;  %v687_v48 = vpop.f32.mrf.mxu1 }
 0x13c   :  { %1970 = vmatpush1.msra.mxu1 %v3880_v31  ;;  %2036 = vmatpush1.msra.mxu0 %v4864_v12  ;;  %v4889_v12 = vld [vmem:[#allocation40_spill] sm:$0xff] }
 0x13d   :  { %1972 = vmatprep.subr.mxu1 %v3906_v47  ;;  %2040 = vmatprep.subr.mxu0 %v4865_v36  ;;  %v4890_v42 = vand.u32 4294901760, %v4889_v12 }
 0x13e   :  { %1974 = vmatpush1.msra.mxu1 %v3919_v11  ;;  %2044 = vmatpush1.msra.mxu0 %v4866_v32 }
 0x13f   :  { %1976 = vmatprep.subr.mxu1 %v3926_v52  ;;  %2048 = vmatprep.subr.mxu0 %v4867_v33 }
 0x140   :  { %1978 = vmatpush1.msra.mxu1 %v3928_v59  ;;  %2011 = vmatprep.mubr.f32.mxu1 %v4860_v55 }
 0x141   :  { %2052 = vmatpush1.msra.mxu0 %v4868_v19  ;;  %2015 = vmatmul.mubr.f32.vlgmr.msra.gmra.mxu1 %v4869_v20 }
 0x142   :  { %2056 = vmatprep.subr.mxu0 %v4870_v62  ;;  %2190 = vmatprep.subr.mxu1 %v3578_v57  ;;  %v4875_v57 = vand.u32 4294901760, %v3736_v37  ;;  %v4885_v37 = vld [vmem:[#allocation16_spill] sm:$0xff] }
 0x143   :  { %2060 = vmatpush1.msra.mxu0 %v4871_v5  ;;  %2192 = vmatpush1.msra.mxu1 %v3580_v63  ;;  %v4876_v63 = vand.u32 4294901760, %v3776_v27  ;;  %v4880_v27 = vand.u32 4294901760, %v4847_v56  ;;  %v4886_v13 = vand.u32 4294901760, %v4885_v37 }
 0x144   :  { %2064 = vmatprep.subr.mxu0 %v4872_v8  ;;  %2194 = vmatprep.subr.mxu1 %v3585_v39  ;;  %v4877_v39 = vand.u32 4294901760, %v4843_v10 }
 0x145   :  { %2068 = vmatpush1.msra.mxu0 %v4873_v17  ;;  %2196 = vmatpush1.msra.mxu1 %v3590_v14  ;;  %v4878_v14 = vand.u32 4294901760, %v3819_v22  ;;  %v4882_v22 = vand.u32 4294901760, %v3865_v0  ;;  %v4887_v0 = vand.u32 4294901760, %v3910_v61  ;;  %v4895_v61 = vld [vmem:[#allocation93_spill] sm:$0xff] }
 0x146   :  { %2072 = vmatprep.subr.mxu0 %v4874_v50  ;;  %2198 = vmatprep.subr.mxu1 %v3595_v30  ;;  %v4879_v30 = vand.u32 4294901760, %v3813_v51  ;;  %v4888_v51 = vand.u32 4294901760, %v3888_v58  ;;  %v4894_v58 = vand.u32 4294901760, %v3949_v34 }
 0x147   :  { %2076 = vmatpush1.msra.mxu0 %v4875_v57  ;;  %2200 = vmatpush1.msra.mxu1 %v4841_v24 }
 0x148   :  { %2080 = vmatprep.subr.mxu0 %v4876_v63  ;;  %2202 = vmatprep.subr.mxu1 %v4842_v16 }
 0x149   :  { %2084 = vmatpush1.msra.mxu0 %v4877_v39  ;;  %2204 = vmatpush1.msra.mxu1 %v4844_v21 }
 0x14a   :  { %2088 = vmatprep.subr.mxu0 %v4878_v14  ;;  %2206 = vmatprep.subr.mxu1 %v4845_v9 }
 0x14b   :  { %2092 = vmatpush1.msra.mxu0 %v4879_v30  ;;  %2208 = vmatpush1.msra.mxu1 %v4846_v15 }
 0x14c   :  { %2096 = vmatprep.subr.mxu0 %v4880_v27  ;;  %2210 = vmatprep.subr.mxu1 %v4848_v18 }
 0x14d   :  { %2100 = vmatpush1.msra.mxu0 %v4881_v53  ;;  %2212 = vmatpush1.msra.mxu1 %v4850_v26 }
 0x14e   :  { %2104 = vmatprep.subr.mxu0 %v4882_v22  ;;  %2214 = vmatprep.subr.mxu1 %v4851_v40 }
 0x14f   :  { %2108 = vmatpush1.msra.mxu0 %v4883_v35  ;;  %2216 = vmatpush1.msra.mxu1 %v4852_v25 }
 0x150   :  { %2112 = vmatprep.subr.mxu0 %v4884_v44  ;;  %2218 = vmatprep.subr.mxu1 %v4853_v45 }
 0x151   :  { %2116 = vmatpush1.msra.mxu0 %v4886_v13  ;;  %2220 = vmatpush1.msra.mxu1 %v4854_v7 }
 0x152   :  { %2120 = vmatprep.subr.mxu0 %v4887_v0  ;;  %2222 = vmatprep.subr.mxu1 %v4855_v41 }
 0x153   :  { %2124 = vmatpush1.msra.mxu0 %v4888_v51  ;;  %2224 = vmatpush1.msra.mxu1 %v4856_v49 }
 0x154   :  { %2128 = vmatprep.subr.mxu0 %v4890_v42  ;;  %2226 = vmatprep.subr.mxu1 %v4857_v6  ;;  %v4897_v6 = vld [vmem:[#allocation17_spill] sm:$0xff] }
 0x155   :  { %2132 = vmatpush1.msra.mxu0 %v4891_v38  ;;  %2228 = vmatpush1.msra.mxu1 %v4858_v28  ;;  %v4898_v54 = vand.u32 4294901760, %v4897_v6  ;;  %v4899_v28 = vld [vmem:[#allocation36_spill] sm:$0xff] }
 0x156   :  { %2136 = vmatprep.subr.mxu0 %v4892_v43  ;;  %2230 = vmatprep.subr.mxu1 %v4893_v4 }
 0x157   :  { %2140 = vmatpush1.msra.mxu0 %v4894_v58  ;;  %2232 = vmatpush1.msra.mxu1 %v4895_v61 }
 0x158   :  { %2144 = vmatprep.subr.mxu0 %v4896_v23  ;;  %2234 = vmatprep.subr.mxu1 %v3838_v29  ;;  %v141_v29 = vlaneseq }
 0x159   :  { %2148 = vmatpush1.msra.mxu0 %v4898_v54  ;;  %2181 = vmatprep.mubr.f32.mxu0 %v4860_v55 }
 0x15a   :  { %2236 = vmatpush1.msra.mxu1 %v4899_v28  ;;  %2183 = vmatmul.mubr.f32.vlgmr.msra.gmra.mxu0 %v4900_v3  ;;  %v142_v34 = vshrl.u32 %v141_v29, 7 }
 0x15b   :  { %2238 = vmatprep.subr.mxu1 %v3872_v60  ;;  %2285 = vmatprep.mubr.f32.mxu1 %v4860_v55  ;;  %v294_v60 = vpop.f32.mrf.mxu0 }
 0x15c   :  { %2240 = vmatpush1.msra.mxu1 %v3855_v1  ;;  %v143_v49 = vsub.s32 0, %v142_v34 }
 0x15d   :  { %2242 = vmatprep.subr.mxu1 %v3890_v2  ;;  %v296_v55 = vpop.f32.mrf.mxu0  ;;  %v147_v2 = vsub.s32 1, %v142_v34 }
 0x15e   :  { %2244 = vmatpush1.msra.mxu1 %v3880_v31  ;;  %v689_v31 = vpop.f32.mrf.mxu1 }
 0x15f   :  { %2246 = vmatprep.subr.mxu1 %v3906_v47  ;;  %v139_v47 = vld [vmem:[%s4186_s2] sm:$0x3]  ;;  %s2392_s2 = smov [#allocation7]  }
 0x160   :  { %2248 = vmatpush1.msra.mxu1 %v3919_v11  ;;  %v148_v16 = vrot.slane %v139_v47, %v147_v2  ;;  %s2304_s24 = sshll.u32 %s2392_s2, 4  ;;  %s2305_s24 = int_to_ptr.vmem [resolvable:$true] %s2304_s24 }
 0x161   :  { %2250 = vmatprep.subr.mxu1 %v3926_v52  ;;  %v144_v52 = vrot.slane %v139_v47, %v143_v49  ;;  %s2361_s25 = scalar_lea.vmem %s2305_s24, 128  ;;  %p2366_p11 = scmp.lt.s32.totalorder %s2305_s24, %s2305_s24 }
 0x162   :  { %2252 = vmatpush1.msra.mxu1 %v3928_v59  ;;  %v297_v9 = vadd.f32 %v296_v55, %v148_v16  ;;  %p2362_p10 = scmp.ne.s32.totalorder %s2305_s24, %s2361_s25  ;;  %p2367_p12 = scmp.lt.s32.totalorder %s2361_s25, %s2361_s25 }
 0x163   :  { %2287 = vmatmul.mubr.f32.vlgmr.msra.gmra.mxu1 %v4900_v3  ;;  %v295_v21 = vadd.f32 %v294_v60, %v144_v52 }
 0x164   :  { %v690_v26 = vadd.f32 %v689_v31, %v297_v9  ;;  %p2368_p13 = por %p2367_p12, %p2366_p11 }
 0x165   :  { %v688_v46 = vadd.f32 %v687_v48, %v295_v21 }
 0x166   :  { %p2369_p0 = pnand %p2368_p13, %p2362_p10 }
 0x173   :  { %v890_v1 = vpop.f32.mrf.mxu0 }
 0x174   :  { %v891_v25 = vadd.f32 %v890_v1, %v688_v46 }
 0x175   :  { %v892_v11 = vpop.f32.mrf.mxu0 }
 0x176   :  { %v893_v45 = vadd.f32 %v892_v11, %v690_v26 }
 0x17b   :  { %v1031_v24 = vpop.f32.mrf.mxu1 }
 0x17c   :  { %v1032_v36 = vadd.f32 %v1031_v24, %v891_v25 }
 0x17d   :  { %v1033_v10 = vpop.f32.mrf.mxu1 }
 0x17e   :  { %v1034_v32 = vadd.f32 %v1033_v10, %v893_v45 }
 0x1b4   :  { %v1296_v59 = vpop.f32.mrf.mxu0 }
 0x1b5   :  { %v1297_v19 = vadd.f32 %v1296_v59, %v1032_v36 }
 0x1b6   :  { %v1298_v15 = vpop.f32.mrf.mxu0 }
 0x1b7   :  { %v1299_v20 = vadd.f32 %v1298_v15, %v1034_v32 }
 0x1bd   :  { %v1433_v56 = vpop.f32.mrf.mxu1 }
 0x1be   :  { %v1434_v5 = vadd.f32 %v1433_v56, %v1297_v19 }
 0x1bf   :  { %v1435_v40 = vpop.f32.mrf.mxu1 }
 0x1c0   :  { %v1436_v8 = vadd.f32 %v1435_v40, %v1299_v20 }
 0x1d6   :  { %v1541_v18 = vpop.f32.mrf.mxu0 }
 0x1d7   :  { %v1542_v57 = vadd.f32 %v1541_v18, %v1434_v5 }
 0x1d8   :  { %v1543_v7 = vpop.f32.mrf.mxu0 }
 0x1d9   :  { %v1544_v63 = vadd.f32 %v1543_v7, %v1436_v8 }
 0x1df   :  { %v1773_v41 = vpop.f32.mrf.mxu1 }
 0x1e0   :  { %v1774_v14 = vadd.f32 %v1773_v41, %v1542_v57 }
 0x1e1   :  { %v1775_v62 = vpop.f32.mrf.mxu1 }
 0x1e2   :  { %v1776_v30 = vadd.f32 %v1775_v62, %v1544_v63 }
 0x1f8   :  { %v1910_v33 = vpop.f32.mrf.mxu0 }
 0x1f9   :  { %v1911_v53 = vadd.f32 %v1910_v33, %v1774_v14 }
 0x1fa   :  { %v1912_v17 = vpop.f32.mrf.mxu0 }
 0x1fb   :  { %v1913_v22 = vadd.f32 %v1912_v17, %v1776_v30 }
 0x201   :  { %v2016_v50 = vpop.f32.mrf.mxu1 }
 0x202   :  { %v2017_v44 = vadd.f32 %v2016_v50, %v1911_v53 }
 0x203   :  { %v2018_v27 = vpop.f32.mrf.mxu1 }
 0x204   :  { %v2019_v37 = vadd.f32 %v2018_v27, %v1913_v22 }
 0x21a   :  { %v2184_v39 = vpop.f32.mrf.mxu0 }
 0x21b   :  { %v2185_v0 = vadd.f32 %v2184_v39, %v2017_v44 }
 0x21c   :  { %v2186_v35 = vpop.f32.mrf.mxu0 }
 0x21d   :  { %v2187_v51 = vadd.f32 %v2186_v35, %v2019_v37 }
 0x223   :  { %v2288_v13 = vpop.f32.mrf.mxu1 }
 0x224   :  { %v2289_v42 = vadd.f32 %v2288_v13, %v2185_v0 }
 0x225   :  { %v2290_v12 = vpop.f32.mrf.mxu1 }
 0x226   :  { %v2291_v38 = vadd.f32 %v2290_v12, %v2187_v51 }
 0x228   :  { %v2295_v43 = vcombine.low %v2289_v42, %v2291_v38 }
 0x22a   :  { %2297 = vst [vmem:[#allocation7] sm:$0x77] %v2295_v43 }
 0x22b   :  { %2372 = shalt.err (!%p2369_p0)
}
 0x22c   :  { %2307 = dma.vmem_to_hbm [thread:$0]  %s2305_s24, 128, %s4187_s3, [#allocation4]  }
 0x22d   :  { %2385 = dma.done.wait [#allocation4], 128  }
 0x22e   :  { %2386 = vsyncadd [#allocation4], 4294967168 }
 0x22f   :  { %2311 = vsyncpa [#allocation3], 1 }
 0x230   :  { %2312 = vsyncpa [#allocation6], 1 }
 0x231   :  { %2313 = vsyncpa [#allocation4], 1 }

</bundles_post_ra>
